<compile_context>
chip_gen: v5e
topology: v5e:2x2
jax: 0.10.0
libtpu: 0.0.40
codegen_flags: <defaults>
</compile_context>

<pallas_src>
import functools
import math

import jax
import jax.numpy as jnp
from jax.experimental import pallas as pl
from jax.experimental.pallas import tpu as pltpu


def _round_up(x, m):
    return ((x + m - 1) // m) * m


def _ist_sage_kernel(a_ref, hw2_ref, zself_ref, o_ref, deg_ref,
                     *, out_feats, out_pad):
    # Grid: (node tiles [parallel], neighbor tiles [arbitrary / reduction]).
    # a_ref:     (TN, TK)    bf16 adjacency tile (rows = dst nodes of this tile)
    # hw2_ref:   (TK, Opad)  bf16 (h @ W2) rows for this neighbor tile
    # zself_ref: (TN, Opad)  f32  (h @ W1 + b) rows for this node tile
    # o_ref:     (TN, Opad)  f32  output tile, resident across k (accumulator)
    # deg_ref:   (TN, 1)     f32  in-degree accumulator scratch
    k = pl.program_id(1)

    @pl.when(k == 0)
    def _init():
        o_ref[...] = jnp.zeros_like(o_ref)
        deg_ref[...] = jnp.zeros_like(deg_ref)

    a = a_ref[...]                                           # bf16, exact 0/1
    # Neighbor aggregation: native bf16 MXU matmul, f32 accumulation.
    o_ref[...] += jnp.dot(a, hw2_ref[...], preferred_element_type=jnp.float32)
    # In-degree: per-row sum of the same (already-resident) tile, f32 accum.
    deg_ref[...] += jnp.sum(a, axis=-1, keepdims=True, dtype=jnp.float32)

    @pl.when(k == pl.num_programs(1) - 1)
    def _finalize():
        deg = deg_ref[...]
        norm = jnp.where(deg > 0.0, 1.0 / jnp.where(deg > 0.0, deg, 1.0), 0.0)
        # norm * (A @ (h @ W2)) + (h @ W1 + b) == cat([h, norm*(A@h)]) @ W.T + b
        z = o_ref[...] * norm + zself_ref[...]

        # LayerNorm(out_feats, elementwise_affine=False), eps = 1e-5.
        # Padded output lanes of z are exactly zero (hw2 / zself zero-padded),
        # so the mean sum needs no mask; only the centered value does.
        inv_o = 1.0 / out_feats
        mean = jnp.sum(z, axis=-1, keepdims=True) * inv_o
        if out_pad == out_feats:
            zc = z - mean
        else:
            lane = jax.lax.broadcasted_iota(jnp.int32, z.shape, dimension=1)
            zc = jnp.where(lane < out_feats, z - mean, 0.0)
        var = jnp.sum(zc * zc, axis=-1, keepdims=True) * inv_o
        zn = zc * jax.lax.rsqrt(var + 1e-5)

        # activation = relu (padded lanes stay zero; sliced off in the wrapper)
        o_ref[...] = jnp.maximum(zn, 0.0)


def ist_sage_layer(adj, h, weight, bias, *, tile_n=512, tile_k=1024):
    """Forward of ISTSAGELayer (eval mode; dropout is identity).

    adj:    (N, N) dense adjacency, adj[dst, src] = 1 for edge src->dst
    h:      (N, F) float32 node features
    weight: (O, 2*F) nn.Linear weight;  bias: (O,)
    """
    N, F = h.shape
    O = weight.shape[0]

    # ---- hoisted work: done once by XLA at full size (good MXU occupancy) ----
    w1 = weight[:, :F].T.astype(jnp.float32)          # (F, O) acts on self feats
    w2 = weight[:, F:].T.astype(jnp.float32)          # (F, O) acts on aggregated
    h32 = h.astype(jnp.float32)
    z_self = h32 @ w1 + bias[None, :].astype(jnp.float32)   # (N, O) f32
    hw2 = (h32 @ w2).astype(jnp.bfloat16)                    # (N, O) bf16 stream

    # ---- tiling: lane-dense O, bf16-friendly (16, 128) aligned tiles ---------
    O_pad = _round_up(max(O, 128), 128)
    tile_n = min(tile_n, _round_up(N, 16))       # 16: bf16 sublane packing
    tile_k = min(tile_k, _round_up(N, 128))      # 128: lane dim
    if N > 256:
        # Keep >= 2 row tiles so the "parallel" axis can span v7x's two cores.
        tile_n = min(tile_n, _round_up((N + 1) // 2, 16))
    Nr = _round_up(N, tile_n)                    # padded output-node rows
    Nc = _round_up(N, tile_k)                    # padded neighbor columns

    # Adjacency in bf16 (0/1 exact) -> halves the dominant HBM stream.
    adj_bf = adj.astype(jnp.bfloat16)
    if (Nr, Nc) == (N, N):
        adj_p = adj_bf                           # skip pad pass when aligned
    else:
        adj_p = jnp.zeros((Nr, Nc), jnp.bfloat16).at[:N, :N].set(adj_bf)
    if (Nc, O_pad) == (N, O):
        hw2_p = hw2
    else:
        hw2_p = jnp.zeros((Nc, O_pad), jnp.bfloat16).at[:N, :O].set(hw2)
    if (Nr, O_pad) == (N, O):
        zself_p = z_self
    else:
        zself_p = jnp.zeros((Nr, O_pad), jnp.float32).at[:N, :O].set(z_self)

    grid = (Nr // tile_n, Nc // tile_k)
    kernel = functools.partial(_ist_sage_kernel, out_feats=O, out_pad=O_pad)

    # VMEM budget: double-buffered streams + resident output + degree scratch,
    # with 2x headroom for Mosaic internal scratch; clamped under v7x's 64 MiB.
    vmem_bytes = (2 * tile_n * tile_k * 2        # adjacency (bf16)
                  + 2 * tile_k * O_pad * 2       # h @ W2 (bf16)
                  + 2 * tile_n * O_pad * 4       # h @ W1 + b (f32)
                  + 2 * tile_n * O_pad * 4       # output (f32)
                  + tile_n * 4)                  # degree scratch
    vmem_limit = int(min(max(2 * vmem_bytes, 32 * 1024 * 1024),
                         48 * 1024 * 1024))

    cost = pl.CostEstimate(
        flops=2 * Nr * Nc * O_pad,
        transcendentals=Nr,
        bytes_accessed=(Nr * Nc * 2                        # bf16 adjacency
                        + Nc * O_pad * 2 * grid[0]         # hw2 re-read / row tile
                        + Nr * O_pad * 4                   # zself
                        + Nr * O_pad * 4),                 # output
    )

    out = pl.pallas_call(
        kernel,
        out_shape=jax.ShapeDtypeStruct((Nr, O_pad), jnp.float32),
        grid_spec=pltpu.PrefetchScalarGridSpec(
            num_scalar_prefetch=0,
            grid=grid,
            in_specs=[
                pl.BlockSpec((tile_n, tile_k), lambda i, k: (i, k)),  # adjacency
                pl.BlockSpec((tile_k, O_pad), lambda i, k: (k, 0)),   # h @ W2
                pl.BlockSpec((tile_n, O_pad), lambda i, k: (i, 0)),   # h @ W1 + b
            ],
            out_specs=pl.BlockSpec((tile_n, O_pad), lambda i, k: (i, 0)),
            scratch_shapes=[pltpu.VMEM((tile_n, 1), jnp.float32)],
        ),
        compiler_params=pltpu.CompilerParams(
            dimension_semantics=("parallel", "arbitrary"),
            vmem_limit_bytes=vmem_limit),
        cost_estimate=cost,
    )(adj_p, hw2_p, zself_p)

    return out[:N, :O]


def _reference(adj, h, weight, bias):
    deg = jnp.sum(adj, axis=1, keepdims=True)
    norm = jnp.where(deg > 0, 1.0 / jnp.where(deg > 0, deg, 1.0), 0.0)
    ah = (adj @ h) * norm
    hc = jnp.concatenate([h, ah], axis=1)
    z = hc @ weight.T + bias
    mean = jnp.mean(z, axis=-1, keepdims=True)
    var = jnp.mean((z - mean) ** 2, axis=-1, keepdims=True)
    zn = (z - mean) / jnp.sqrt(var + 1e-5)      # LayerNorm, no affine
    return jnp.maximum(zn, 0.0)                 # activation = relu


if __name__ == "__main__":
    N, in_feats, out_feats = 128, 32, 32

    key = jax.random.PRNGKey(0)
    k_adj, k_h, k_w, k_b = jax.random.split(key, 4)

    # synthetic directed graph as dense adjacency (adj[dst, src] = 1)
    adj = (jax.random.uniform(k_adj, (N, N)) < 0.1).astype(jnp.float32)
    h = jax.random.normal(k_h, (N, in_feats), dtype=jnp.float32)

    # deterministic parameter init (matches init_layer: U(-stdv, stdv))
    stdv = 1.0 / math.sqrt(2 * in_feats)
    weight = jax.random.uniform(k_w, (out_feats, 2 * in_feats),
                                minval=-stdv, maxval=stdv, dtype=jnp.float32)
    bias = jax.random.uniform(k_b, (out_feats,),
                              minval=-stdv, maxval=stdv, dtype=jnp.float32)

    out = ist_sage_layer(adj, h, weight, bias)
    out = jax.block_until_ready(out)

    ref = _reference(adj, h, weight, bias)
    assert out.shape == (N, out_feats)
    # bf16 (h @ W2) stream -> ~1e-3 relative error in the aggregated term.
    assert jnp.allclose(out, ref, atol=1e-2, rtol=1e-2), "mismatch vs reference"

    print("KERNEL_OK")
</pallas_src>

<mosaic_0001>
module attributes {stable_mosaic.version = 11 : i64} {
  func.func @_ist_sage_kernel(%arg0: i32, %arg1: i32, %arg2: memref<128x128xbf16, #tpu.memory_space<vmem>>, %arg3: memref<128x128xbf16, #tpu.memory_space<vmem>>, %arg4: memref<128x128xf32, #tpu.memory_space<vmem>>, %arg5: memref<128x128xf32, #tpu.memory_space<vmem>>, %arg6: memref<128x1xf32, #tpu.memory_space<vmem>>) attributes {dimension_semantics = [#tpu.dimension_semantics<parallel>, #tpu.dimension_semantics<arbitrary>], iteration_bounds = array<i64: 1, 1>, scalar_prefetch = 0 : i64, scratch_operands = 1 : i64, tpu.core_type = #tpu.core_type<tc>, window_params = [{transform_indices = @transform_0, window_bounds = array<i64: 128, 128>}, {transform_indices = @transform_1, window_bounds = array<i64: 128, 128>}, {transform_indices = @transform_2, window_bounds = array<i64: 128, 128>}, {transform_indices = @transform_3, window_bounds = array<i64: 128, 128>}]} {
    %c0_i32 = arith.constant 0 : i32
    %0 = arith.cmpi eq, %arg1, %c0_i32 : i32
    %1 = arith.extui %0 : i1 to i32
    %c0_i32_0 = arith.constant 0 : i32
    %2 = arith.cmpi ne, %1, %c0_i32_0 : i32
    scf.if %2 {
      %cst_15 = arith.constant 0.000000e+00 : f32
      %18 = vector.broadcast %cst_15 : f32 to vector<128x128xf32>
      %c0_16 = arith.constant 0 : index
      %c0_17 = arith.constant 0 : index
      %19 = vector.load %arg5[%c0_16, %c0_17] : memref<128x128xf32, #tpu.memory_space<vmem>>, vector<128x128xf32>
      tpu.vector_store %arg5[%c0_16, %c0_17], %18 {strides = array<i32>} : memref<128x128xf32, #tpu.memory_space<vmem>>, vector<128x128xf32>,
      %cst_18 = arith.constant 0.000000e+00 : f32
      %20 = vector.broadcast %cst_18 : f32 to vector<128x1xf32>
      %c0_19 = arith.constant 0 : index
      %c0_20 = arith.constant 0 : index
      %21 = vector.load %arg6[%c0_19, %c0_20] : memref<128x1xf32, #tpu.memory_space<vmem>>, vector<128x1xf32>
      tpu.vector_store %arg6[%c0_19, %c0_20], %20 {strides = array<i32>} : memref<128x1xf32, #tpu.memory_space<vmem>>, vector<128x1xf32>,
    } else {
    }
    %c0 = arith.constant 0 : index
    %c0_1 = arith.constant 0 : index
    %3 = vector.load %arg2[%c0, %c0_1] : memref<128x128xbf16, #tpu.memory_space<vmem>>, vector<128x128xbf16>
    %c0_2 = arith.constant 0 : index
    %c0_3 = arith.constant 0 : index
    %4 = vector.load %arg5[%c0_2, %c0_3] : memref<128x128xf32, #tpu.memory_space<vmem>>, vector<128x128xf32>
    %c0_4 = arith.constant 0 : index
    %c0_5 = arith.constant 0 : index
    %5 = vector.load %arg3[%c0_4, %c0_5] : memref<128x128xbf16, #tpu.memory_space<vmem>>, vector<128x128xbf16>
    %cst = arith.constant dense<0.000000e+00> : vector<128x128xf32>
    %6 = tpu.matmul %3, %5, %cst {dimension_numbers = #tpu.dot_dimension_numbers<[1], [0], [0], [1], [0, 0, 1, 1], [], []>} : vector<128x128xbf16>, vector<128x128xbf16>, vector<128x128xf32> -> vector<128x128xf32>
    %7 = arith.addf %4, %6 : vector<128x128xf32>
    %c0_6 = arith.constant 0 : index
    %c0_7 = arith.constant 0 : index
    %8 = vector.load %arg5[%c0_6, %c0_7] : memref<128x128xf32, #tpu.memory_space<vmem>>, vector<128x128xf32>
    tpu.vector_store %arg5[%c0_6, %c0_7], %7 {strides = array<i32>} : memref<128x128xf32, #tpu.memory_space<vmem>>, vector<128x128xf32>,
    %c0_8 = arith.constant 0 : index
    %c0_9 = arith.constant 0 : index
    %9 = vector.load %arg6[%c0_8, %c0_9] : memref<128x1xf32, #tpu.memory_space<vmem>>, vector<128x1xf32>
    %10 = arith.extf %3 : vector<128x128xbf16> to vector<128x128xf32>
    %cst_10 = arith.constant dense<0.000000e+00> : vector<128xf32>
    %11 = vector.multi_reduction <add>, %10, %cst_10 [1] : vector<128x128xf32> to vector<128xf32>
    %12 = vector.shape_cast %11 : vector<128xf32> to vector<128x1xf32>
    %13 = arith.addf %9, %12 : vector<128x1xf32>
    %c0_11 = arith.constant 0 : index
    %c0_12 = arith.constant 0 : index
    %14 = vector.load %arg6[%c0_11, %c0_12] : memref<128x1xf32, #tpu.memory_space<vmem>>, vector<128x1xf32>
    tpu.vector_store %arg6[%c0_11, %c0_12], %13 {strides = array<i32>} : memref<128x1xf32, #tpu.memory_space<vmem>>, vector<128x1xf32>,
    %c0_i32_13 = arith.constant 0 : i32
    %15 = arith.cmpi eq, %arg1, %c0_i32_13 : i32
    %16 = arith.extui %15 : i1 to i32
    %c0_i32_14 = arith.constant 0 : i32
    %17 = arith.cmpi ne, %16, %c0_i32_14 : i32
    scf.if %17 {
      %c0_15 = arith.constant 0 : index
      %c0_16 = arith.constant 0 : index
      %18 = vector.load %arg6[%c0_15, %c0_16] : memref<128x1xf32, #tpu.memory_space<vmem>>, vector<128x1xf32>
      %cst_17 = arith.constant 0.000000e+00 : f32
      %19 = vector.broadcast %cst_17 : f32 to vector<128x1xf32>
      %20 = arith.cmpf ogt, %18, %19 : vector<128x1xf32>
      %cst_18 = arith.constant 0.000000e+00 : f32
      %21 = vector.broadcast %cst_18 : f32 to vector<128x1xf32>
      %22 = arith.cmpf ogt, %18, %21 : vector<128x1xf32>
      %cst_19 = arith.constant 1.000000e+00 : f32
      %23 = vector.broadcast %cst_19 : f32 to vector<128x1xf32>
      %24 = arith.select %22, %18, %23 : vector<128x1xi1>, vector<128x1xf32>
      %cst_20 = arith.constant 1.000000e+00 : f32
      %25 = vector.broadcast %cst_20 : f32 to vector<128x1xf32>
      %26 = arith.divf %25, %24 : vector<128x1xf32>
      %cst_21 = arith.constant 0.000000e+00 : f32
      %27 = vector.broadcast %cst_21 : f32 to vector<128x1xf32>
      %28 = arith.select %20, %26, %27 : vector<128x1xi1>, vector<128x1xf32>
      %c0_22 = arith.constant 0 : index
      %c0_23 = arith.constant 0 : index
      %29 = vector.load %arg5[%c0_22, %c0_23] : memref<128x128xf32, #tpu.memory_space<vmem>>, vector<128x128xf32>
      %30 = vector.broadcast %28 : vector<128x1xf32> to vector<128x128xf32>
      %31 = arith.mulf %29, %30 : vector<128x128xf32>
      %c0_24 = arith.constant 0 : index
      %c0_25 = arith.constant 0 : index
      %32 = vector.load %arg4[%c0_24, %c0_25] : memref<128x128xf32, #tpu.memory_space<vmem>>, vector<128x128xf32>
      %33 = arith.addf %31, %32 : vector<128x128xf32>
      %cst_26 = arith.constant dense<0.000000e+00> : vector<128xf32>
      %34 = vector.multi_reduction <add>, %33, %cst_26 [1] : vector<128x128xf32> to vector<128xf32>
      %35 = vector.shape_cast %34 : vector<128xf32> to vector<128x1xf32>
      %cst_27 = arith.constant 3.125000e-02 : f32
      %36 = vector.broadcast %cst_27 : f32 to vector<128x1xf32>
      %37 = arith.mulf %35, %36 : vector<128x1xf32>
      %38 = tpu.iota {dimensions = array<i32: 1>} : vector<128x128xi32>
      %c32_i32 = arith.constant 32 : i32
      %39 = vector.broadcast %c32_i32 : i32 to vector<128x128xi32>
      %40 = arith.cmpi slt, %38, %39 : vector<128x128xi32>
      %41 = vector.broadcast %37 : vector<128x1xf32> to vector<128x128xf32>
      %42 = arith.subf %33, %41 : vector<128x128xf32>
      %cst_28 = arith.constant 0.000000e+00 : f32
      %43 = vector.broadcast %cst_28 : f32 to vector<128x128xf32>
      %44 = arith.select %40, %42, %43 : vector<128x128xi1>, vector<128x128xf32>
      %45 = arith.mulf %44, %44 : vector<128x128xf32>
      %cst_29 = arith.constant dense<0.000000e+00> : vector<128xf32>
      %46 = vector.multi_reduction <add>, %45, %cst_29 [1] : vector<128x128xf32> to vector<128xf32>
      %47 = vector.shape_cast %46 : vector<128xf32> to vector<128x1xf32>
      %cst_30 = arith.constant 3.125000e-02 : f32
      %48 = vector.broadcast %cst_30 : f32 to vector<128x1xf32>
      %49 = arith.mulf %47, %48 : vector<128x1xf32>
      %cst_31 = arith.constant 9.99999974E-6 : f32
      %50 = vector.broadcast %cst_31 : f32 to vector<128x1xf32>
      %51 = arith.addf %49, %50 : vector<128x1xf32>
      %52 = math.rsqrt %51 : vector<128x1xf32>
      %53 = vector.broadcast %52 : vector<128x1xf32> to vector<128x128xf32>
      %54 = arith.mulf %44, %53 : vector<128x128xf32>
      %cst_32 = arith.constant 0.000000e+00 : f32
      %55 = vector.broadcast %cst_32 : f32 to vector<128x128xf32>
      %56 = arith.maximumf %54, %55 : vector<128x128xf32>
      %c0_33 = arith.constant 0 : index
      %c0_34 = arith.constant 0 : index
      %57 = vector.load %arg5[%c0_33, %c0_34] : memref<128x128xf32, #tpu.memory_space<vmem>>, vector<128x128xf32>
      tpu.vector_store %arg5[%c0_33, %c0_34], %56 {strides = array<i32>} : memref<128x128xf32, #tpu.memory_space<vmem>>, vector<128x128xf32>,
    } else {
    }
    return
  }
  func.func @transform_0(%arg0: i32, %arg1: i32) -> (i32, i32) {
    %c0_i32 = arith.constant 0 : i32
    return %arg0, %arg1 : i32, i32
  }
  func.func @transform_1(%arg0: i32, %arg1: i32) -> (i32, i32) {
    %c0_i32 = arith.constant 0 : i32
    %c0_i32_0 = arith.constant 0 : i32
    return %arg1, %c0_i32 : i32, i32
  }
  func.func @transform_2(%arg0: i32, %arg1: i32) -> (i32, i32) {
    %c0_i32 = arith.constant 0 : i32
    %c0_i32_0 = arith.constant 0 : i32
    return %arg0, %c0_i32 : i32, i32
  }
  func.func @transform_3(%arg0: i32, %arg1: i32) -> (i32, i32) {
    %c0_i32 = arith.constant 0 : i32
    %c0_i32_0 = arith.constant 0 : i32
    return %arg0, %c0_i32 : i32, i32
  }
}

</mosaic_0001>

<bundles_post_ra>
// kernel: tpu_custom_call.1
= control target key start
LH: loop header
LB: loop body
LE: loop exit
PB: predicated region body
PF: predicated region fallthrough
CT: control target
= control target key end

     0   :  { %8 = vsyncpa [#allocation4], 0  ;;  %s2274_s0 = inlined_call_operand.hbm [shape: bf16[128,128], index: 0, kind: input, shape index: {}]   ;;  %s2275_s1 = inlined_call_operand.hbm [shape: bf16[128,128], index: 1, kind: input, shape index: {}]   ;;  %s2276_s2 = inlined_call_operand.hbm [shape: f32[128,128], index: 2, kind: input, shape index: {}]   ;;  %s2277_s3 = inlined_call_operand.hbm [shape: f32[128,128], index: 3, kind: output, shape index: {}]  }
   0x1   :  { %9 = vsyncpa [#allocation7], 0 }
   0x2   :  { %10 = vsyncpa [#allocation5], 0  ;;  %s28_s14 = sshll.u32 %s2275_s1, 4  ;;  %s1546_s15 = smov [#allocation6]   ;;  %s29_s14 = int_to_ptr.hbm [resolvable:$true] %s28_s14 }
   0x3   :  { %s30_s16 = sshll.u32 %s1546_s15, 4  ;;  %s15_s19 = sshll.u32 %s2274_s0, 4  ;;  %s31_s16 = int_to_ptr.vmem [resolvable:$true] %s30_s16  ;;  %s16_s19 = int_to_ptr.hbm [resolvable:$true] %s15_s19 }
   0x4   :  { %s1547_s20 = smov 64   ;;  %s1548_s21 = smov 4  }
   0x5   :  { %36 = dma.hbm_to_vmem [thread:$0]  %s29_s14, 1024, %s31_s16, [#allocation7], %s1547_s20, %s1547_s20, %s1548_s21  }
   0x6   :  { %s1549_s22 = smov [#allocation3]   ;;  %s41_s26 = sshll.u32 %s2276_s2, 4  ;;  %s42_s26 = int_to_ptr.hbm [resolvable:$true] %s41_s26 }
   0x7   :  { %s17_s23 = sshll.u32 %s1549_s22, 4  ;;  %s1550_s1 = smov [#allocation8]   ;;  %s18_s23 = int_to_ptr.vmem [resolvable:$true] %s17_s23 }
   0x8   :  { %23 = dma.hbm_to_vmem [thread:$0]  %s16_s19, 1024, %s18_s23, [#allocation4], %s1547_s20, %s1547_s20, %s1548_s21  }
   0x9   :  { %s43_s27 = sshll.u32 %s1550_s1, 4  ;;  %s1551_s28 = smov 128   ;;  %s44_s27 = int_to_ptr.vmem [resolvable:$true] %s43_s27 }
   0xa   :  { %s1552_s29 = smov 8  }
   0xb   :  { %49 = dma.hbm_to_vmem [thread:$0]  %s42_s26, 2048, %s44_s27, [#allocation7], %s1551_s28, %s1551_s28, %s1552_s29  }
   0xc   :  { %1540 = dma.done.wait [#allocation4], 1024  }
   0xd   :  { %1541 = vsyncadd [#allocation4], 4294966272 }
   0xe   :  { %1542 = dma.done.wait [#allocation7], 3072  }
   0xf   :  { %1543 = vsyncadd [#allocation7], 4294964224  ;;  %v103_v0 = vld [vmem:[#allocation3 + $0x10] sm:$0xff]   ;;  %v101_v1 = vld [vmem:[#allocation3 + $0x8] sm:$0xff]   ;;  %vm82_vm0 = vcmask 7168   ;;  %v1553_v27 = vmov 0.0  }
  0x10   :  { %v99_v2 = vld [vmem:[#allocation3] sm:$0xff]   ;;  %v344_v3 = vunpack.c.l.bf16 %v103_v0  ;;  %v342_v4 = vunpack.c.l.bf16 %v101_v1  ;;  %v345_v6 = vunpack.c.h.bf16 %v103_v0  ;;  %v343_v7 = vunpack.c.h.bf16 %v101_v1  ;;  %v1342_v10 = vld [vmem:[#allocation6 + $0x38] sm:$0xff]  ;;  %v1341_v12 = vld [vmem:[#allocation6 + $0x30] sm:$0xff]  ;;  %87 = vst.msk [vmem:[#allocation2 + $0x20] sm:$0xff] %vm82_vm0, %v1553_v27  ;;  %s1555_s0 = smov [#allocation9]   ;;  %s1249_s5 = sshll.u32 %s2277_s3, 4  ;;  %s1250_s5 = int_to_ptr.hbm [resolvable:$true] %s1249_s5 }
  0x11   :  { %v340_v5 = vunpack.c.l.bf16 %v99_v2  ;;  %v341_v8 = vunpack.c.h.bf16 %v99_v2  ;;  %v107_v9 = vld [vmem:[#allocation3 + $0x20] sm:$0xff]   ;;  %v105_v11 = vld [vmem:[#allocation3 + $0x18] sm:$0xff]   ;;  %243 = vmatpush.bf16.msra.mxu0 %v1342_v10  ;;  %1343 = vmatpush.bf16.msra.mxu1 %v1342_v10  ;;  %v1340_v16 = vld [vmem:[#allocation6 + $0x28] sm:$0xff]  ;;  %83 = vst.msk [vmem:[#allocation2] sm:$0xff] %vm82_vm0, %v1553_v27  ;;  %v1554_v42 = vmov 0   ;;  %s1247_s2 = sshll.u32 %s1555_s0, 4  ;;  %s1248_s2 = int_to_ptr.vmem [resolvable:$true] %s1247_s2 }
  0x12   :  { %364 = vadd.xlane.f32.xlu2 %v344_v3  ;;  %360 = vadd.xlane.f32.xlu1 %v342_v4  ;;  %v348_v13 = vunpack.c.l.bf16 %v107_v9  ;;  %v347_v14 = vunpack.c.h.bf16 %v105_v11  ;;  %v346_v15 = vunpack.c.l.bf16 %v105_v11  ;;  %v110_v17 = vld [vmem:[#allocation3 + $0x2c] sm:$0xff]   ;;  %v109_v18 = vld [vmem:[#allocation3 + $0x28] sm:$0xf]  ;;  %v1339_v19 = vld [vmem:[#allocation6 + $0x20] sm:$0xff]  ;;  %v349_v22 = vunpack.c.h.bf16 %v107_v9  ;;  %84 = vst.msk [vmem:[#allocation2 + $0x8] sm:$0xff] %vm82_vm0, %v1553_v27 }
  0x13   :  { %356 = vadd.xlane.f32.xlu0 %v340_v5  ;;  %1344 = vmatpush.bf16.msra.mxu2 %v1342_v10  ;;  %v351_v20 = vunpack.c.l.bf16 %v110_v17  ;;  %v350_v21 = vunpack.c.l.bf16 %v109_v18  ;;  %v1338_v23 = vld [vmem:[#allocation6 + $0x18] sm:$0xff]  ;;  %v112_v25 = vld [vmem:[#allocation3 + $0x34] sm:$0xf]  ;;  %v352_v30 = vunpack.c.h.bf16 %v110_v17  ;;  %85 = vst.msk [vmem:[#allocation2 + $0x10] sm:$0xff] %vm82_vm0, %v1553_v27  ;;  %v1336_v31 = vld [vmem:[#allocation6 + $0x8] sm:$0xff] }
  0x14   :  { %1345 = vmatpush.bf16.msra.mxu3 %v1342_v10  ;;  %v113_v24 = vld [vmem:[#allocation3 + $0x38] sm:$0xff]   ;;  %v1337_v26 = vld [vmem:[#allocation6 + $0x10] sm:$0xff]  ;;  %v353_v29 = vunpack.c.l.bf16 %v112_v25  ;;  %86 = vst.msk [vmem:[#allocation2 + $0x18] sm:$0xff] %vm82_vm0, %v1553_v27  ;;  %v1335_v32 = vld [vmem:[#allocation6] sm:$0xff]  ;;  %1379 = vset.pattern.permute.xlu0 %v1554_v42 }
  0x15   :  { %244 = vmatpush.bf16.msra.mxu0 %v1341_v12  ;;  %1346 = vmatpush.bf16.msra.mxu1 %v1341_v12  ;;  %v354_v28 = vunpack.c.l.bf16 %v113_v24  ;;  %88 = vst.msk [vmem:[#allocation2 + $0x28] sm:$0xff] %vm82_vm0, %v1553_v27  ;;  %v355_v33 = vunpack.c.h.bf16 %v113_v24  ;;  %v1327_v34 = vld [vmem:[#allocation3] sm:$0xff]  ;;  %v1329_v35 = vld [vmem:[#allocation3 + $0x10] sm:$0xff]  ;;  %v1328_v36 = vld [vmem:[#allocation3 + $0x8] sm:$0xff] }
  0x16   :  { %89 = vst.msk [vmem:[#allocation2 + $0x30] sm:$0xff] %vm82_vm0, %v1553_v27  ;;  %v1331_v37 = vld [vmem:[#allocation3 + $0x20] sm:$0xff]  ;;  %v1330_v38 = vld [vmem:[#allocation3 + $0x18] sm:$0xff]  ;;  %v1333_v39 = vld [vmem:[#allocation3 + $0x30] sm:$0xff]  ;;  %1377 = vset.pattern.permute.xlu1 %v1554_v42  ;;  %1378 = vset.pattern.permute.xlu2 %v1554_v42 }
  0x17   :  { %1347 = vmatpush.bf16.msra.mxu2 %v1341_v12  ;;  %90 = vst.msk [vmem:[#allocation2 + $0x38] sm:$0xff] %vm82_vm0, %v1553_v27  ;;  %v1332_v40 = vld [vmem:[#allocation3 + $0x28] sm:$0xff]  ;;  %v1334_v41 = vld [vmem:[#allocation3 + $0x38] sm:$0xff]  ;;  %v328_v43 = vld [vmem:[#allocation2 + $0x20] sm:$0xff] }
  0x18   :  { %1348 = vmatpush.bf16.msra.mxu3 %v1341_v12  ;;  %91 = vst.msk [vmem:[#allocation2 + $0x40] sm:$0xff] %vm82_vm0, %v1553_v27  ;;  %v324_v45 = vld [vmem:[#allocation2] sm:$0xff] }
  0x19   :  { %245 = vmatpush.bf16.msra.mxu0 %v1340_v16  ;;  %1349 = vmatpush.bf16.msra.mxu1 %v1340_v16  ;;  %92 = vst.msk [vmem:[#allocation2 + $0x48] sm:$0xff] %vm82_vm0, %v1553_v27  ;;  %v325_v54 = vld [vmem:[#allocation2 + $0x8] sm:$0xff] }
  0x1a   :  { %366 = vadd.xlane.f32.xlu2 %v345_v6  ;;  %362 = vadd.xlane.f32.xlu1 %v343_v7  ;;  %93 = vst.msk [vmem:[#allocation2 + $0x50] sm:$0xff] %vm82_vm0, %v1553_v27  ;;  %v326_v44 = vld [vmem:[#allocation2 + $0x10] sm:$0xff] }
  0x1b   :  { %358 = vadd.xlane.f32.xlu0 %v341_v8  ;;  %1350 = vmatpush.bf16.msra.mxu2 %v1340_v16  ;;  %94 = vst.msk [vmem:[#allocation2 + $0x58] sm:$0xff] %vm82_vm0, %v1553_v27  ;;  %v327_v53 = vld [vmem:[#allocation2 + $0x18] sm:$0xff] }
  0x1c   :  { %1351 = vmatpush.bf16.msra.mxu3 %v1340_v16  ;;  %95 = vst.msk [vmem:[#allocation2 + $0x60] sm:$0xff] %vm82_vm0, %v1553_v27  ;;  %v329_v52 = vld [vmem:[#allocation2 + $0x28] sm:$0xff] }
  0x1d   :  { %246 = vmatpush.bf16.msra.mxu0 %v1339_v19  ;;  %1352 = vmatpush.bf16.msra.mxu1 %v1339_v19  ;;  %96 = vst.msk [vmem:[#allocation2 + $0x68] sm:$0xff] %vm82_vm0, %v1553_v27  ;;  %v330_v4 = vld [vmem:[#allocation2 + $0x30] sm:$0xff] }
  0x1e   :  { %97 = vst.msk [vmem:[#allocation2 + $0x70] sm:$0xff] %vm82_vm0, %v1553_v27  ;;  %v331_v3 = vld [vmem:[#allocation2 + $0x38] sm:$0xff] }
  0x1f   :  { %1353 = vmatpush.bf16.msra.mxu2 %v1339_v19  ;;  %98 = vst.msk [vmem:[#allocation2 + $0x78] sm:$0xff] %vm82_vm0, %v1553_v27  ;;  %v332_v2 = vld [vmem:[#allocation2 + $0x40] sm:$0xff] }
  0x20   :  { %1354 = vmatpush.bf16.msra.mxu3 %v1339_v19 }
  0x21   :  { %247 = vmatpush.bf16.msra.mxu0 %v1338_v23  ;;  %1355 = vmatpush.bf16.msra.mxu1 %v1338_v23 }
  0x22   :  { %372 = vadd.xlane.f32.xlu2 %v348_v13  ;;  %370 = vadd.xlane.f32.xlu1 %v347_v14 }
  0x23   :  { %368 = vadd.xlane.f32.xlu0 %v346_v15  ;;  %1356 = vmatpush.bf16.msra.mxu2 %v1338_v23 }
  0x24   :  { %1357 = vmatpush.bf16.msra.mxu3 %v1338_v23 }
  0x25   :  { %248 = vmatpush.bf16.msra.mxu0 %v1337_v26  ;;  %1358 = vmatpush.bf16.msra.mxu1 %v1337_v26 }
  0x27   :  { %1359 = vmatpush.bf16.msra.mxu2 %v1337_v26 }
  0x28   :  { %1360 = vmatpush.bf16.msra.mxu3 %v1337_v26  ;;  %v335_v26 = vld [vmem:[#allocation2 + $0x58] sm:$0xff] }
  0x29   :  { %249 = vmatpush.bf16.msra.mxu0 %v1336_v31  ;;  %1361 = vmatpush.bf16.msra.mxu1 %v1336_v31 }
  0x2a   :  { %378 = vadd.xlane.f32.xlu2 %v351_v20  ;;  %376 = vadd.xlane.f32.xlu1 %v350_v21 }
  0x2b   :  { %374 = vadd.xlane.f32.xlu0 %v349_v22  ;;  %1362 = vmatpush.bf16.msra.mxu2 %v1336_v31 }
  0x2c   :  { %1363 = vmatpush.bf16.msra.mxu3 %v1336_v31 }
  0x2d   :  { %250 = vmatpush.bf16.msra.mxu0 %v1335_v32  ;;  %1364 = vmatpush.bf16.msra.mxu1 %v1335_v32 }
  0x2f   :  { %1365 = vmatpush.bf16.msra.mxu2 %v1335_v32 }
  0x30   :  { %251 = vmatmul.bf16.vlgmr.msra.gmra.mxu0 %v1327_v34  ;;  %261 = vmatmul.bf16.vlgmr.msra.gmra.mxu1 %v1329_v35 }
  0x31   :  { %1366 = vmatpush.bf16.msra.mxu3 %v1335_v32 }
  0x32   :  { %384 = vadd.xlane.f32.xlu2 %v354_v28  ;;  %382 = vadd.xlane.f32.xlu1 %v353_v29  ;;  %v334_v29 = vld [vmem:[#allocation2 + $0x50] sm:$0xff] }
  0x33   :  { %380 = vadd.xlane.f32.xlu0 %v352_v30  ;;  %271 = vmatmul.bf16.vlgmr.msra.gmra.mxu2 %v1331_v37  ;;  %v333_v30 = vld [vmem:[#allocation2 + $0x48] sm:$0xff] }
  0x34   :  { %281 = vmatmul.bf16.vlgmr.msra.gmra.mxu3 %v1333_v39 }
  0x3b   :  { %386 = vadd.xlane.f32.xlu0 %v355_v33 }
  0x40   :  { %256 = vmatmul.bf16.gmra.mxu0 %v1328_v36  ;;  %266 = vmatmul.bf16.gmra.mxu1 %v1330_v38 }
  0x43   :  { %276 = vmatmul.bf16.gmra.mxu2 %v1332_v40 }
  0x44   :  { %286 = vmatmul.bf16.gmra.mxu3 %v1334_v41 }
  0x85   :  { %v365_v46 = vpop.xlane.xlu2 %364  ;;  %v361_v47 = vpop.xlane.xlu1 %360 }
  0x86   :  { %v392_v48 = vadd.f32 %v365_v46, %v328_v43  ;;  %v390_v49 = vadd.f32 %v361_v47, %v326_v44  ;;  %v357_v50 = vpop.xlane.xlu0 %356 }
  0x87   :  { %v388_v51 = vadd.f32 %v357_v50, %v324_v45 }
  0x88   :  { %409 = vst.msk [vmem:[#allocation2 + $0x20] sm:$0xff] %vm82_vm0, %v392_v48 }
  0x89   :  { %407 = vst.msk [vmem:[#allocation2 + $0x10] sm:$0xff] %vm82_vm0, %v390_v49 }
  0x8a   :  { %405 = vst.msk [vmem:[#allocation2] sm:$0xff] %vm82_vm0, %v388_v51 }
  0x8d   :  { %v367_v55 = vpop.xlane.xlu2 %366  ;;  %v363_v56 = vpop.xlane.xlu1 %362 }
  0x8e   :  { %v393_v57 = vadd.f32 %v367_v55, %v329_v52  ;;  %v359_v58 = vpop.xlane.xlu0 %358  ;;  %v391_v59 = vadd.f32 %v363_v56, %v327_v53 }
  0x8f   :  { %v389_v60 = vadd.f32 %v359_v58, %v325_v54  ;;  %v1607_v61 = vld [vmem:[#allocation2 + $0x20] sm:$0xff] }
  0x90   :  { %410 = vst.msk [vmem:[#allocation2 + $0x28] sm:$0xff] %vm82_vm0, %v393_v57  ;;  %v1610_v62 = vld [vmem:[#allocation2 + $0x10] sm:$0xff]  ;;  %vm444_vm1 = vcmp.gt.f32.partialorder %v1607_v61, 0.0 }
  0x91   :  { %406 = vst.msk [vmem:[#allocation2 + $0x8] sm:$0xff] %vm82_vm0, %v389_v60  ;;  %vm442_vm2 = vcmp.gt.f32.partialorder %v1610_v62, 0.0  ;;  %v1615_v63 = vld [vmem:[#allocation2] sm:$0xff]  ;;  %v1620_v0 = vsel %vm444_vm1, %v1607_v61, 1.0 }
  0x92   :  { %408 = vst.msk [vmem:[#allocation2 + $0x18] sm:$0xff] %vm82_vm0, %v391_v59  ;;  %v1626_v1 = vsel %vm442_vm2, %v1610_v62, 1.0  ;;  %vm440_vm3 = vcmp.gt.f32.partialorder %v1615_v63, 0.0  ;;  %1380 = vrcp.f32 %v1620_v0  ;;  %v541_v19 = vand.u32 2147483647, %v1620_v0 }
  0x93   :  { %1382 = vrcp.f32 %v1626_v1  ;;  %v1634_v5 = vsel %vm440_vm3, %v1615_v63, 1.0  ;;  %v511_v12 = vand.u32 2147483647, %v1626_v1  ;;  %v513_v13 = vand.u32 2147483648, %v1626_v1 }
  0x94   :  { %1384 = vrcp.f32 %v1634_v5  ;;  %vm507_vm4 = vweird.f32 %v1626_v1  ;;  %v543_v20 = vand.u32 2147483648, %v1620_v0  ;;  %vm477_vm9 = vweird.f32 %v1634_v5 }
  0x95   :  { %v373_v6 = vpop.xlane.xlu2 %372  ;;  %v371_v7 = vpop.xlane.xlu1 %370  ;;  %vm1671_vm8 = vcmp.eq.f32.partialorder %v511_v12, 8.507059e+37  ;;  %v514_v28 = vor.u32 1.1754944e-38, %v513_v13  ;;  %v481_v33 = vand.u32 2147483647, %v1634_v5  ;;  %vm537_vm10 = vweird.f32 %v1620_v0 }
  0x96   :  { %v396_v8 = vadd.f32 %v373_v6, %v332_v2  ;;  %v369_v9 = vpop.xlane.xlu0 %368  ;;  %v395_v10 = vadd.f32 %v371_v7, %v331_v3  ;;  %v483_v36 = vand.u32 2147483648, %v1634_v5  ;;  %v544_v54 = vor.u32 1.1754944e-38, %v543_v20 }
  0x97   :  { %v394_v11 = vadd.f32 %v369_v9, %v330_v4  ;;  %v1639_v14 = vld [vmem:[#allocation2 + $0x28] sm:$0xff]  ;;  %vm1703_vm14 = vcmp.eq.f32.partialorder %v481_v33, 8.507059e+37 }
  0x98   :  { %v1641_v15 = vpop.eup %1380  ;;  %413 = vst.msk [vmem:[#allocation2 + $0x40] sm:$0xff] %vm82_vm0, %v396_v8  ;;  %v1645_v16 = vld [vmem:[#allocation2 + $0x8] sm:$0xff]  ;;  %vm2278_vm5 = vcmp.gt.f32.partialorder %v1639_v14, 0.0  ;;  %v484_v53 = vor.u32 1.1754944e-38, %v483_v36  ;;  %v336_v8 = vld [vmem:[#allocation2 + $0x60] sm:$0xff] }
  0x99   :  { %v1383_v17 = vpop.eup %1382  ;;  %411 = vst.msk [vmem:[#allocation2 + $0x30] sm:$0xff] %vm82_vm0, %v394_v11  ;;  %vm441_vm6 = vcmp.gt.f32.partialorder %v1645_v16, 0.0  ;;  %v533_v18 = vmul.f32 %v1641_v15, %v1620_v0  ;;  %v1654_v21 = vld [vmem:[#allocation2 + $0x18] sm:$0xff]  ;;  %v1667_v24 = vsel %vm2278_vm5, %v1639_v14, 1.0  ;;  %vm538_vm15 = vweird.f32 %v1641_v15  ;;  %v337_v4 = vld [vmem:[#allocation2 + $0x68] sm:$0xff] }
  0x9a   :  { %412 = vst.msk [vmem:[#allocation2 + $0x38] sm:$0xff] %vm82_vm0, %v395_v10  ;;  %v503_v22 = vmul.f32 %v1383_v17, %v1626_v1  ;;  %v1661_v23 = vsel %vm441_vm6, %v1645_v16, 1.0  ;;  %vm2279_vm7 = vcmp.gt.f32.partialorder %v1654_v21, 0.0  ;;  %v1669_v25 = vpop.eup %1384  ;;  %vm508_vm11 = vweird.f32 %v1383_v17  ;;  %v338_v1 = vld [vmem:[#allocation2 + $0x70] sm:$0xff] }
  0x9b   :  { %1386 = vrcp.f32 %v1661_v23  ;;  %v473_v32 = vmul.f32 %v1669_v25, %v1634_v5  ;;  %v534_v34 = vsub.f32 1.0, %v533_v18  ;;  %v1685_v38 = vsel %vm2279_vm7, %v1654_v21, 1.0  ;;  %vm509_vm13 = vmor %vm507_vm4, %vm508_vm11 }
  0x9c   :  { %v504_v31 = vsub.f32 1.0, %v503_v22  ;;  %1388 = vrcp.f32 %v1667_v24  ;;  %v496_v45 = vand.u32 2147483647, %v1661_v23  ;;  %v498_v46 = vand.u32 2147483648, %v1661_v23 }
  0x9d   :  { %v379_v35 = vpop.xlane.xlu2 %378  ;;  %v377_v37 = vpop.xlane.xlu1 %376  ;;  %v474_v42 = vsub.f32 1.0, %v473_v32  ;;  %1390 = vrcp.f32 %v1685_v38  ;;  %vm478_vm12 = vweird.f32 %v1669_v25  ;;  %v535_v49 = vmul.f32 %v1641_v15, %v534_v34 }
  0x9e   :  { %v399_v39 = vadd.f32 %v379_v35, %v335_v26  ;;  %v375_v40 = vpop.xlane.xlu0 %374  ;;  %v505_v41 = vmul.f32 %v1383_v17, %v504_v31  ;;  %v398_v43 = vadd.f32 %v377_v37, %v334_v29  ;;  %vm1712_vm5 = vcmp.eq.f32.partialorder %v541_v19, 8.507059e+37  ;;  %vm479_vm11 = vmor %vm477_vm9, %vm478_vm12 }
  0x9f   :  { %v397_v44 = vadd.f32 %v375_v40, %v333_v30  ;;  %v475_v48 = vmul.f32 %v1669_v25, %v474_v42  ;;  %vm1726_vm7 = vcmp.eq.f32.partialorder %v496_v45, 8.507059e+37  ;;  %v499_v3 = vor.u32 1.1754944e-38, %v498_v46  ;;  %v1786_v35 = vld [vmem:[#allocation2 + $0x40] sm:$0xff] }
  0xa0   :  { %416 = vst.msk [vmem:[#allocation2 + $0x58] sm:$0xff] %vm82_vm0, %v399_v39  ;;  %v506_v47 = vadd.f32 %v1383_v17, %v505_v41  ;;  %v1695_v50 = vld [vmem:[#allocation2 + $0x30] sm:$0xff]  ;;  %v536_v10 = vadd.f32 %v1641_v15, %v535_v49  ;;  %v526_v0 = vand.u32 2147483647, %v1685_v38  ;;  %v528_v30 = vand.u32 2147483648, %v1685_v38  ;;  %v339_v41 = vld [vmem:[#allocation2 + $0x78] sm:$0xff] }
  0xa1   :  { %v1697_v51 = vpop.eup %1386  ;;  %414 = vst.msk [vmem:[#allocation2 + $0x48] sm:$0xff] %vm82_vm0, %v397_v44  ;;  %v476_v56 = vadd.f32 %v1669_v25, %v475_v48  ;;  %vm446_vm4 = vcmp.gt.f32.partialorder %v1695_v50, 0.0  ;;  %v558_v61 = vand.u32 2147483648, %v1667_v24 }
  0xa2   :  { %v510_v55 = vsel %vm509_vm13, %v1383_v17, %v506_v47  ;;  %415 = vst.msk [vmem:[#allocation2 + $0x50] sm:$0xff] %vm82_vm0, %v398_v43  ;;  %v488_v57 = vmul.f32 %v1697_v51, %v1661_v23  ;;  %v1717_v59 = vpop.eup %1388  ;;  %vm492_vm13 = vweird.f32 %v1661_v23  ;;  %v1742_v62 = vsel %vm446_vm4, %v1695_v50, 1.0 }
  0xa3   :  { %v515_v60 = vsel %vm1671_vm8, %v514_v28, %v510_v55  ;;  %v480_v7 = vsel %vm479_vm11, %v1669_v25, %v476_v56  ;;  %v1734_v5 = vpop.eup %1390  ;;  %vm493_vm8 = vweird.f32 %v1697_v51  ;;  %v548_v17 = vmul.f32 %v1717_v59, %v1667_v24 }
  0xa4   :  { %v714_v6 = vsel %vm442_vm2, %v515_v60, 0.0  ;;  %v489_v9 = vsub.f32 1.0, %v488_v57  ;;  %v485_v11 = vsel %vm1703_vm14, %v484_v53, %v480_v7  ;;  %vm1753_vm2 = vmor %vm537_vm10, %vm538_vm15  ;;  %v518_v28 = vmul.f32 %v1734_v5, %v1685_v38 }
  0xa5   :  { %756 = vperm.xlu0 %1379, %v714_v6   ;;  %v385_v12 = vpop.xlane.xlu2 %384  ;;  %v383_v13 = vpop.xlane.xlu1 %382  ;;  %v712_v18 = vsel %vm440_vm3, %v485_v11, 0.0  ;;  %vm522_vm3 = vweird.f32 %v1685_v38  ;;  %1392 = vrcp.f32 %v1742_v62  ;;  %v540_v29 = vsel %vm1753_vm2, %v1641_v15, %v536_v10  ;;  %vm494_vm9 = vmor %vm492_vm13, %vm493_vm8 }
  0xa6   :  { %v402_v19 = vadd.f32 %v385_v12, %v338_v1  ;;  %v381_v20 = vpop.xlane.xlu0 %380  ;;  %v490_v22 = vmul.f32 %v1697_v51, %v489_v9  ;;  %v401_v25 = vadd.f32 %v383_v13, %v337_v4  ;;  %746 = vperm.xlu1 %1377, %v712_v18   ;;  %v519_v32 = vsub.f32 1.0, %v518_v28 }
  0xa7   :  { %v400_v26 = vadd.f32 %v381_v20, %v336_v8  ;;  %vm523_vm10 = vweird.f32 %v1734_v5  ;;  %v549_v33 = vsub.f32 1.0, %v548_v17  ;;  %vm552_vm14 = vweird.f32 %v1667_v24 }
  0xa8   :  { %419 = vst.msk [vmem:[#allocation2 + $0x70] sm:$0xff] %vm82_vm0, %v402_v19  ;;  %v491_v63 = vadd.f32 %v1697_v51, %v490_v22  ;;  %v1768_v31 = vld [vmem:[#allocation2 + $0x48] sm:$0xff]  ;;  %v556_v23 = vand.u32 2147483647, %v1667_v24  ;;  %v545_v37 = vsel %vm1712_vm5, %v544_v54, %v540_v29  ;;  %v520_v39 = vmul.f32 %v1734_v5, %v519_v32  ;;  %vm1800_vm15 = vmor %vm522_vm3, %vm523_vm10 }
  0xa9   :  { %417 = vst.msk [vmem:[#allocation2 + $0x60] sm:$0xff] %vm82_vm0, %v400_v26  ;;  %vm449_vm12 = vcmp.gt.f32.partialorder %v1768_v31, 0.0  ;;  %v529_v43 = vor.u32 1.1754944e-38, %v528_v30  ;;  %v571_v44 = vand.u32 2147483647, %v1742_v62  ;;  %v550_v45 = vmul.f32 %v1717_v59, %v549_v33 }
  0xaa   :  { %v495_v15 = vsel %vm494_vm9, %v1697_v51, %v491_v63  ;;  %418 = vst.msk [vmem:[#allocation2 + $0x68] sm:$0xff] %vm82_vm0, %v401_v25  ;;  %v1782_v34 = vsel %vm449_vm12, %v1768_v31, 1.0  ;;  %v521_v47 = vadd.f32 %v1734_v5, %v520_v39  ;;  %vm527_vm5 = vcmp.eq.f32.partialorder %v526_v0, 8.507059e+37  ;;  %v1814_v51 = vld [vmem:[#allocation2 + $0x38] sm:$0xff] }
  0xab   :  { %v500_v36 = vsel %vm1726_vm7, %v499_v3, %v495_v15  ;;  %1394 = vrcp.f32 %v1782_v34  ;;  %v1393_v46 = vpop.eup %1392  ;;  %v573_v16 = vand.u32 2147483648, %v1742_v62  ;;  %v716_v38 = vsel %vm444_vm1, %v545_v37, 0.0  ;;  %v1875_v25 = vld [vmem:[#allocation2 + $0x58] sm:$0xff] }
  0xac   :  { %v713_v40 = vsel %vm441_vm6, %v500_v36, 0.0  ;;  %vm448_vm6 = vcmp.gt.f32.partialorder %v1786_v35, 0.0  ;;  %v563_v49 = vmul.f32 %v1393_v46, %v1742_v62  ;;  %vm567_vm7 = vweird.f32 %v1742_v62 }
  0xad   :  { %751 = vperm.xlu2 %1378, %v713_v40   ;;  %vm553_vm11 = vweird.f32 %v1717_v59  ;;  %v525_v53 = vsel %vm1800_vm15, %v1734_v5, %v521_v47  ;;  %v551_v54 = vadd.f32 %v1717_v59, %v550_v45  ;;  %vm1821_vm1 = vcmp.eq.f32.partialorder %v571_v44, 8.507059e+37 }
  0xae   :  { %v387_v48 = vpop.xlane.xlu0 %386  ;;  %766 = vperm.xlu1 %1377, %v716_v38   ;;  %v530_v55 = vsel %vm527_vm5, %v529_v43, %v525_v53  ;;  %v564_v56 = vsub.f32 1.0, %v563_v49  ;;  %v1828_v58 = vsel %vm448_vm6, %v1786_v35, 1.0  ;;  %v574_v2 = vor.u32 1.1754944e-38, %v573_v16  ;;  %vm1842_vm2 = vmor %vm552_vm14, %vm553_vm11 }
  0xaf   :  { %v403_v52 = vadd.f32 %v387_v48, %v339_v41  ;;  %v616_v3 = vand.u32 2147483647, %v1782_v34  ;;  %1396 = vrcp.f32 %v1828_v58  ;;  %vm447_vm13 = vcmp.gt.f32.partialorder %v1814_v51, 0.0  ;;  %v1924_v38 = vld [vmem:[#allocation2 + $0x70] sm:$0xff] }
  0xb0   :  { %v1830_v60 = vld [vmem:[#allocation2 + $0x60] sm:$0xff]  ;;  %v565_v4 = vmul.f32 %v1393_v46, %v564_v56  ;;  %vm568_vm8 = vweird.f32 %v1393_v46  ;;  %v618_v7 = vand.u32 2147483648, %v1782_v34  ;;  %v555_v10 = vsel %vm1842_vm2, %v1717_v59, %v551_v54 }
  0xb1   :  { %v1395_v1 = vpop.eup %1394  ;;  %420 = vst.msk [vmem:[#allocation2 + $0x78] sm:$0xff] %vm82_vm0, %v403_v52  ;;  %vm2296_vm0 = vcmp.gt.f32.partialorder %v1654_v21, 0.0  ;;  %v559_v5 = vor.u32 1.1754944e-38, %v558_v61  ;;  %vm452_vm3 = vcmp.gt.f32.partialorder %v1830_v60, 0.0  ;;  %v1860_v13 = vsel %vm447_vm13, %v1814_v51, 1.0  ;;  %vm569_vm9 = vmor %vm567_vm7, %vm568_vm8 }
  0xb2   :  { %v608_v6 = vmul.f32 %v1395_v1, %v1782_v34  ;;  %v715_v9 = vsel %vm2296_vm0, %v530_v55, 0.0  ;;  %v566_v11 = vadd.f32 %v1393_v46, %v565_v4  ;;  %v1855_v24 = vsel %vm452_vm3, %v1830_v60, 1.0 }
  0xb3   :  { %vm557_vm10 = vcmp.eq.f32.partialorder %v556_v23, 8.507059e+37  ;;  %v601_v21 = vand.u32 2147483647, %v1828_v58  ;;  %v603_v59 = vand.u32 2147483648, %v1828_v58  ;;  %1398 = vrcp.f32 %v1855_v24 }
  0xb4   :  { %v609_v12 = vsub.f32 1.0, %v608_v6  ;;  %v570_v17 = vsel %vm569_vm9, %v1393_v46, %v566_v11  ;;  %vm613_vm14 = vweird.f32 %v1395_v1  ;;  %v560_v19 = vsel %vm557_vm10, %v559_v5, %v555_v10  ;;  %v1913_v46 = vld [vmem:[#allocation2 + $0x50] sm:$0xff]  ;;  %v1958_v10 = vld [vmem:[#allocation2 + $0x68] sm:$0xff] }
  0xb5   :  { %761 = vperm.xlu2 %1378, %v715_v9   ;;  %v1397_v20 = vpop.eup %1396  ;;  %v575_v22 = vsel %vm1821_vm1, %v574_v2, %v570_v17  ;;  %vm612_vm15 = vweird.f32 %v1782_v34  ;;  %vm1870_vm5 = vcmp.eq.f32.partialorder %v616_v3, 8.507059e+37  ;;  %1400 = vrcp.f32 %v1860_v13 }
  0xb6   :  { %v610_v18 = vmul.f32 %v1395_v1, %v609_v12  ;;  %v718_v26 = vsel %vm446_vm4, %v575_v22, 0.0  ;;  %v619_v28 = vor.u32 1.1754944e-38, %v618_v7  ;;  %v593_v63 = vmul.f32 %v1397_v20, %v1828_v58  ;;  %vm614_vm7 = vmor %vm612_vm15, %vm613_vm14 }
  0xb7   :  { %776 = vperm.xlu1 %1377, %v718_v26   ;;  %vm2299_vm11 = vcmp.gt.f32.partialorder %v1639_v14, 0.0  ;;  %vm597_vm1 = vweird.f32 %v1828_v58  ;;  %vm1885_vm8 = vcmp.eq.f32.partialorder %v601_v21, 8.507059e+37  ;;  %v604_v32 = vor.u32 1.1754944e-38, %v603_v59 }
  0xb8   :  { %v611_v27 = vadd.f32 %v1395_v1, %v610_v18  ;;  %v1880_v29 = vld [vmem:[#allocation2 + $0x78] sm:$0xff]  ;;  %v717_v0 = vsel %vm2299_vm11, %v560_v19, 0.0  ;;  %v594_v33 = vsub.f32 1.0, %v593_v63  ;;  %vm451_vm4 = vcmp.gt.f32.partialorder %v1875_v25, 0.0 }
  0xb9   :  { %vm455_vm2 = vcmp.gt.f32.partialorder %v1880_v29, 0.0  ;;  %v1399_v15 = vpop.eup %1398  ;;  %vm598_vm0 = vweird.f32 %v1397_v20  ;;  %v661_v14 = vand.u32 2147483647, %v1855_v24  ;;  %v1897_v23 = vsel %vm451_vm4, %v1875_v25, 1.0 }
  0xba   :  { %v615_v50 = vsel %vm614_vm7, %v1395_v1, %v611_v27  ;;  %v595_v37 = vmul.f32 %v1397_v20, %v594_v33  ;;  %v653_v39 = vmul.f32 %v1399_v15, %v1855_v24  ;;  %v1905_v40 = vsel %vm455_vm2, %v1880_v29, 1.0  ;;  %vm599_vm10 = vmor %vm597_vm1, %vm598_vm0 }
  0xbb   :  { %v620_v34 = vsel %vm1870_vm5, %v619_v28, %v615_v50  ;;  %v1401_v41 = vpop.eup %1400  ;;  %vm657_vm9 = vweird.f32 %v1855_v24  ;;  %v663_v42 = vand.u32 2147483648, %v1855_v24  ;;  %v586_v43 = vand.u32 2147483647, %v1860_v13 }
  0xbc   :  { %v721_v36 = vsel %vm449_vm12, %v620_v34, 0.0  ;;  %1402 = vrcp.f32 %v1897_v23  ;;  %v596_v31 = vadd.f32 %v1397_v20, %v595_v37  ;;  %v654_v44 = vsub.f32 1.0, %v653_v39 }
  0xbd   :  { %791 = vperm.xlu0 %1379, %v721_v36   ;;  %771 = vperm.xlu2 %1378, %v717_v0   ;;  %v578_v45 = vmul.f32 %v1401_v41, %v1860_v13  ;;  %vm582_vm12 = vweird.f32 %v1860_v13  ;;  %vm658_vm14 = vweird.f32 %v1399_v15  ;;  %vm1918_vm15 = vcmp.eq.f32.partialorder %v661_v14, 8.507059e+37 }
  0xbe   :  { %v588_v16 = vand.u32 2147483648, %v1860_v13  ;;  %1404 = vrcp.f32 %v1905_v40  ;;  %v600_v48 = vsel %vm599_vm10, %v1397_v20, %v596_v31  ;;  %v655_v49 = vmul.f32 %v1399_v15, %v654_v44  ;;  %vm1938_vm1 = vmor %vm657_vm9, %vm658_vm14 }
  0xbf   :  { %v579_v52 = vsub.f32 1.0, %v578_v45  ;;  %vm583_vm5 = vweird.f32 %v1401_v41  ;;  %v605_v53 = vsel %vm1885_vm8, %v604_v32, %v600_v48  ;;  %v664_v54 = vor.u32 1.1754944e-38, %v663_v42 }
  0xc0   :  { %vm1928_vm7 = vcmp.eq.f32.partialorder %v586_v43, 8.507059e+37  ;;  %vm450_vm11 = vcmp.gt.f32.partialorder %v1913_v46, 0.0  ;;  %v720_v55 = vsel %vm448_vm6, %v605_v53, 0.0  ;;  %v656_v56 = vadd.f32 %v1399_v15, %v655_v49  ;;  %vm1945_vm0 = vmor %vm582_vm12, %vm583_vm5 }
  0xc1   :  { %v580_v58 = vmul.f32 %v1401_v41, %v579_v52  ;;  %vm454_vm8 = vcmp.gt.f32.partialorder %v1924_v38, 0.0  ;;  %786 = vperm.xlu1 %1377, %v720_v55   ;;  %v589_v35 = vor.u32 1.1754944e-38, %v588_v16  ;;  %vm642_vm6 = vweird.f32 %v1897_v23 }
  0xc2   :  { %v1403_v1 = vpop.eup %1402  ;;  %v646_v3 = vand.u32 2147483647, %v1897_v23  ;;  %v466_v4 = vsel %vm450_vm11, %v1913_v46, 1.0  ;;  %v660_v6 = vsel %vm1938_vm1, %v1399_v15, %v656_v56  ;;  %v648_v9 = vand.u32 2147483648, %v1897_v23 }
  0xc3   :  { %v581_v7 = vadd.f32 %v1401_v41, %v580_v58  ;;  %v638_v8 = vmul.f32 %v1403_v1, %v1897_v23  ;;  %v665_v11 = vsel %vm1918_vm15, %v664_v54, %v660_v6  ;;  %v706_v12 = vand.u32 2147483647, %v1905_v40 }
  0xc4   :  { %v1405_v5 = vpop.eup %1404  ;;  %1406 = vrcp.f32 %v466_v4  ;;  %v1966_v24 = vsel %vm454_vm8, %v1924_v38, 1.0  ;;  %v724_v13 = vsel %vm452_vm3, %v665_v11, 0.0  ;;  %vm643_vm9 = vweird.f32 %v1403_v1  ;;  %v262_v11 = vpop.f32.mrf.mxu1 }
  0xc5   :  { %v585_v21 = vsel %vm1945_vm0, %v1401_v41, %v581_v7  ;;  %v639_v59 = vsub.f32 1.0, %v638_v8  ;;  %v698_v17 = vmul.f32 %v1405_v5, %v1905_v40  ;;  %806 = vperm.xlu0 %1379, %v724_v13   ;;  %v708_v19 = vand.u32 2147483648, %v1905_v40  ;;  %vm644_vm14 = vmor %vm642_vm6, %vm643_vm9 }
  0xc6   :  { %v590_v18 = vsel %vm1928_vm7, %v589_v35, %v585_v21  ;;  %vm453_vm12 = vcmp.gt.f32.partialorder %v1958_v10, 0.0  ;;  %1408 = vrcp.f32 %v1966_v24  ;;  %vm647_vm3 = vcmp.eq.f32.partialorder %v646_v3, 8.507059e+37 }
  0xc7   :  { %v719_v20 = vsel %vm447_vm13, %v590_v18, 0.0  ;;  %v640_v60 = vmul.f32 %v1403_v1, %v639_v59  ;;  %v699_v22 = vsub.f32 1.0, %v698_v17  ;;  %vm703_vm10 = vweird.f32 %v1405_v5  ;;  %v272_v18 = vpop.f32.mrf.mxu2 }
  0xc8   :  { %781 = vperm.xlu2 %1378, %v719_v20   ;;  %v469_v27 = vsel %vm453_vm12, %v1958_v10, 1.0  ;;  %v649_v63 = vor.u32 1.1754944e-38, %v648_v9  ;;  %vm702_vm13 = vweird.f32 %v1905_v40  ;;  %vm1986_vm15 = vcmp.eq.f32.partialorder %v706_v12, 8.507059e+37  ;;  %v252_v9 = vpop.f32.mrf.mxu0 }
  0xc9   :  { %v641_v62 = vadd.f32 %v1403_v1, %v640_v60  ;;  %v700_v26 = vmul.f32 %v1405_v5, %v699_v22  ;;  %1410 = vrcp.f32 %v469_v27  ;;  %v709_v32 = vor.u32 1.1754944e-38, %v708_v19  ;;  %vm704_vm5 = vmor %vm702_vm13, %vm703_vm10  ;;  %v842_v60 = vld [vmem:[#allocation8 + $0x10] sm:$0xff] }
  0xca   :  { %v1407_v28 = vpop.eup %1406  ;;  %vm627_vm7 = vweird.f32 %v466_v4  ;;  %v631_v15 = vand.u32 2147483647, %v466_v4  ;;  %v633_v34 = vand.u32 2147483648, %v466_v4  ;;  %vm687_vm6 = vweird.f32 %v1966_v24 }
  0xcb   :  { %v645_v0 = vsel %vm644_vm14, %v1403_v1, %v641_v62  ;;  %v701_v30 = vadd.f32 %v1405_v5, %v700_v26  ;;  %v623_v50 = vmul.f32 %v1407_v28, %v466_v4  ;;  %vm628_vm1 = vweird.f32 %v1407_v28  ;;  %v840_v26 = vld [vmem:[#allocation8] sm:$0xff] }
  0xcc   :  { %v650_v33 = vsel %vm647_vm3, %v649_v63, %v645_v0  ;;  %v1409_v14 = vpop.eup %1408  ;;  %vm1998_vm0 = vmor %vm627_vm7, %vm628_vm1  ;;  %v634_v44 = vor.u32 1.1754944e-38, %v633_v34  ;;  %v691_v29 = vand.u32 2147483647, %v1966_v24  ;;  %v693_v16 = vand.u32 2147483648, %v1966_v24  ;;  %v264_v59 = vpop.f32.mrf.mxu1  ;;  %v843_v34 = vld [vmem:[#allocation8 + $0x18] sm:$0xff] }
  0xcd   :  { %v723_v23 = vsel %vm451_vm4, %v650_v33, 0.0  ;;  %v705_v36 = vsel %vm704_vm5, %v1405_v5, %v701_v30  ;;  %v624_v37 = vsub.f32 1.0, %v623_v50  ;;  %v683_v40 = vmul.f32 %v1409_v14, %v1966_v24  ;;  %v841_v24 = vld [vmem:[#allocation8 + $0x8] sm:$0xff] }
  0xce   :  { %801 = vperm.xlu1 %1377, %v723_v23   ;;  %v710_v39 = vsel %vm1986_vm15, %v709_v32, %v705_v36  ;;  %vm2002_vm4 = vcmp.eq.f32.partialorder %v631_v15, 8.507059e+37  ;;  %vm672_vm9 = vweird.f32 %v469_v27  ;;  %v678_v52 = vand.u32 2147483648, %v469_v27  ;;  %v282_v32 = vpop.f32.mrf.mxu3  ;;  %v844_v15 = vld [vmem:[#allocation8 + $0x20] sm:$0xff] }
  0xcf   :  { %v727_v41 = vsel %vm455_vm2, %v710_v39, 0.0  ;;  %v625_v42 = vmul.f32 %v1407_v28, %v624_v37  ;;  %v1411_v43 = vpop.eup %1410  ;;  %v684_v45 = vsub.f32 1.0, %v683_v40  ;;  %vm688_vm2 = vweird.f32 %v1409_v14  ;;  %v274_v30 = vpop.f32.mrf.mxu2 }
  0xd0   :  { %821 = vperm.xlu0 %1379, %v727_v41   ;;  %v668_v48 = vmul.f32 %v1411_v43, %v469_v27  ;;  %vm673_vm3 = vweird.f32 %v1411_v43  ;;  %v676_v61 = vand.u32 2147483647, %v469_v27  ;;  %vm689_vm10 = vmor %vm687_vm6, %vm688_vm2  ;;  %v694_v58 = vor.u32 1.1754944e-38, %v693_v16  ;;  %v254_v5 = vpop.f32.mrf.mxu0  ;;  %v847_v41 = vld [vmem:[#allocation8 + $0x38] sm:$0xff] }
  0xd1   :  { %v626_v47 = vadd.f32 %v1407_v28, %v625_v42  ;;  %v685_v49 = vmul.f32 %v1409_v14, %v684_v45  ;;  %vm692_vm14 = vcmp.eq.f32.partialorder %v691_v29, 8.507059e+37  ;;  %vm674_vm13 = vmor %vm672_vm9, %vm673_vm3  ;;  %v679_v35 = vor.u32 1.1754944e-38, %v678_v52  ;;  %v845_v42 = vld [vmem:[#allocation8 + $0x28] sm:$0xff] }
  0xd2   :  { %v669_v54 = vsub.f32 1.0, %v668_v48  ;;  %vm677_vm15 = vcmp.eq.f32.partialorder %v676_v61, 8.507059e+37 }
  0xd3   :  { %v630_v53 = vsel %vm1998_vm0, %v1407_v28, %v626_v47  ;;  %v686_v56 = vadd.f32 %v1409_v14, %v685_v49 }
  0xd4   :  { %v635_v55 = vsel %vm2002_vm4, %v634_v44, %v630_v53  ;;  %v670_v1 = vmul.f32 %v1411_v43, %v669_v54  ;;  %v267_v19 = vpop.f32.mrf.mxu1  ;;  %v846_v44 = vld [vmem:[#allocation8 + $0x30] sm:$0xff]  ;;  %v849_v53 = vld [vmem:[#allocation8 + $0x48] sm:$0xff] }
  0xd5   :  { %v722_v57 = vsel %vm450_vm11, %v635_v55, 0.0  ;;  %v690_v2 = vsel %vm689_vm10, %v1409_v14, %v686_v56  ;;  %v850_v54 = vld [vmem:[#allocation8 + $0x50] sm:$0xff] }
  0xd6   :  { %796 = vperm.xlu2 %1378, %v722_v57   ;;  %v695_v3 = vsel %vm692_vm14, %v694_v58, %v690_v2  ;;  %v671_v4 = vadd.f32 %v1411_v43, %v670_v1  ;;  %v848_v1 = vld [vmem:[#allocation8 + $0x40] sm:$0xff] }
  0xd7   :  { %v726_v6 = vsel %vm454_vm8, %v695_v3, 0.0  ;;  %v277_v31 = vpop.f32.mrf.mxu2 }
  0xd8   :  { %816 = vperm.xlu1 %1377, %v726_v6   ;;  %v675_v46 = vsel %vm674_vm13, %v1411_v43, %v671_v4  ;;  %v257_v38 = vpop.f32.mrf.mxu0  ;;  %v284_v43 = vpop.f32.mrf.mxu3  ;;  %v852_v6 = vld [vmem:[#allocation8 + $0x60] sm:$0xff] }
  0xd9   :  { %v680_v7 = vsel %vm677_vm15, %v679_v35, %v675_v46  ;;  %v853_v46 = vld [vmem:[#allocation8 + $0x68] sm:$0xff] }
  0xda   :  { %v725_v8 = vsel %vm453_vm12, %v680_v7, 0.0 }
  0xdc   :  { %v269_v50 = vpop.f32.mrf.mxu1 }
  0xde   :  { %811 = vperm.xlu2 %1378, %v725_v8  }
  0xe0   :  { %v259_v22 = vpop.f32.mrf.mxu0  ;;  %v287_v57 = vpop.f32.mrf.mxu3 }
 0x107   :  { %v752_v12 = vpop.permute.xlu2 %751 }
 0x108   :  { %v825_v13 = vmul.f32 %v752_v12, %v254_v5  ;;  %v289_v12 = vpop.f32.mrf.mxu3 }
 0x10a   :  { %v2022_v21 = vadd.f32 %v841_v24, %v825_v13  ;;  %v851_v13 = vld [vmem:[#allocation8 + $0x58] sm:$0xff] }
 0x10c   :  { %874 = vadd.xlane.f32.xlu1 %v2022_v21 }
 0x10f   :  { %v762_v17 = vpop.permute.xlu2 %761 }
 0x110   :  { %v827_v0 = vmul.f32 %v762_v17, %v259_v22  ;;  %v855_v17 = vld [vmem:[#allocation8 + $0x78] sm:$0xff] }
 0x112   :  { %v2033_v36 = vadd.f32 %v843_v34, %v827_v0 }
 0x117   :  { %v757_v20 = vpop.permute.xlu0 %756  ;;  %v772_v63 = vpop.permute.xlu2 %771 }
 0x118   :  { %v826_v10 = vmul.f32 %v757_v20, %v257_v38  ;;  %v747_v62 = vpop.permute.xlu1 %746  ;;  %v829_v39 = vmul.f32 %v772_v63, %v264_v59 }
 0x119   :  { %v824_v27 = vmul.f32 %v747_v62, %v252_v9 }
 0x11a   :  { %v2025_v28 = vadd.f32 %v842_v60, %v826_v10  ;;  %v2039_v29 = vadd.f32 %v845_v42, %v829_v39  ;;  %v854_v10 = vld [vmem:[#allocation8 + $0x70] sm:$0xff] }
 0x11b   :  { %v2028_v51 = vadd.f32 %v840_v26, %v824_v27  ;;  %v920_v26 = vlaneseq }
 0x11c   :  { %876 = vadd.xlane.f32.xlu0 %v2025_v28 }
 0x11d   :  { %872 = vadd.xlane.f32.xlu2 %v2028_v51  ;;  %v2070_v27 = vand.u32 127, %v920_v26 }
 0x11f   :  { %vm922_vm11 = vcmp.lt.s32.totalorder %v2070_v27, 32 }
 0x120   :  { %v767_v33 = vpop.permute.xlu1 %766 }
 0x121   :  { %v828_v14 = vmul.f32 %v767_v33, %v262_v11  ;;  %v279_v11 = vpop.f32.mrf.mxu2 }
 0x122   :  { %v782_v37 = vpop.permute.xlu2 %781 }
 0x123   :  { %v2031_v23 = vadd.f32 %v844_v15, %v828_v14  ;;  %v831_v40 = vmul.f32 %v782_v37, %v269_v50 }
 0x125   :  { %880 = vadd.xlane.f32.xlu1 %v2031_v23  ;;  %878 = vadd.xlane.f32.xlu2 %v2033_v36  ;;  %v2037_v47 = vadd.f32 %v847_v41, %v831_v40 }
 0x129   :  { %v777_v25 = vpop.permute.xlu1 %776 }
 0x12a   :  { %v830_v45 = vmul.f32 %v777_v25, %v267_v19 }
 0x12c   :  { %v2041_v16 = vadd.f32 %v846_v44, %v830_v45 }
 0x12d   :  { %886 = vadd.xlane.f32.xlu1 %v2037_v47  ;;  %882 = vadd.xlane.f32.xlu2 %v2039_v29 }
 0x12e   :  { %884 = vadd.xlane.f32.xlu0 %v2041_v16 }
 0x12f   :  { %v792_v48 = vpop.permute.xlu0 %791 }
 0x130   :  { %v833_v49 = vmul.f32 %v792_v48, %v274_v30  ;;  %v797_v52 = vpop.permute.xlu2 %796 }
 0x131   :  { %v834_v61 = vmul.f32 %v797_v52, %v277_v31 }
 0x132   :  { %v2046_v55 = vadd.f32 %v849_v53, %v833_v49 }
 0x133   :  { %v2048_v56 = vadd.f32 %v850_v54, %v834_v61  ;;  %v787_v58 = vpop.permute.xlu1 %786 }
 0x134   :  { %v832_v2 = vmul.f32 %v787_v58, %v272_v18 }
 0x135   :  { %892 = vadd.xlane.f32.xlu1 %v2048_v56 }
 0x136   :  { %890 = vadd.xlane.f32.xlu0 %v2046_v55  ;;  %v2052_v35 = vadd.f32 %v848_v1, %v832_v2 }
 0x137   :  { %v807_v4 = vpop.permute.xlu0 %806 }
 0x138   :  { %v812_v3 = vpop.permute.xlu2 %811  ;;  %888 = vadd.xlane.f32.xlu2 %v2052_v35  ;;  %v836_v8 = vmul.f32 %v807_v4, %v282_v32 }
 0x139   :  { %v837_v7 = vmul.f32 %v812_v3, %v284_v43 }
 0x13a   :  { %v2055_v9 = vadd.f32 %v852_v6, %v836_v8 }
 0x13b   :  { %v2057_v5 = vadd.f32 %v853_v46, %v837_v7 }
 0x13d   :  { %898 = vadd.xlane.f32.xlu1 %v2057_v5 }
 0x13e   :  { %896 = vadd.xlane.f32.xlu0 %v2055_v9 }
 0x140   :  { %v802_v24 = vpop.permute.xlu1 %801 }
 0x141   :  { %v835_v59 = vmul.f32 %v802_v24, %v279_v11 }
 0x142   :  { %v822_v38 = vpop.permute.xlu0 %821 }
 0x143   :  { %v2061_v18 = vadd.f32 %v851_v13, %v835_v59  ;;  %v839_v19 = vmul.f32 %v822_v38, %v289_v12 }
 0x145   :  { %894 = vadd.xlane.f32.xlu2 %v2061_v18  ;;  %v2064_v20 = vadd.f32 %v855_v17, %v839_v19 }
 0x147   :  { %902 = vadd.xlane.f32.xlu0 %v2064_v20 }
 0x14a   :  { %v817_v60 = vpop.permute.xlu1 %816 }
 0x14b   :  { %v838_v22 = vmul.f32 %v817_v60, %v287_v57 }
 0x14d   :  { %v2067_v62 = vadd.f32 %v854_v10, %v838_v22 }
 0x14f   :  { %900 = vadd.xlane.f32.xlu2 %v2067_v62 }
 0x17f   :  { %v875_v63 = vpop.xlane.xlu1 %874 }
 0x180   :  { %v905_v0 = vmul.f32 0.03125, %v875_v63 }
 0x182   :  { %v924_v30 = vsub.f32 %v2022_v21, %v905_v0 }
 0x184   :  { %v2076_v32 = vsel %vm922_vm11, %v924_v30, 0.0 }
 0x185   :  { %v956_v50 = vmul.f32 %v2076_v32, %v2076_v32 }
 0x187   :  { %973 = vadd.xlane.f32.xlu2 %v956_v50 }
 0x18f   :  { %v877_v33 = vpop.xlane.xlu0 %876 }
 0x190   :  { %v906_v15 = vmul.f32 0.03125, %v877_v33  ;;  %v873_v34 = vpop.xlane.xlu2 %872 }
 0x191   :  { %v904_v37 = vmul.f32 0.03125, %v873_v34 }
 0x192   :  { %v925_v14 = vsub.f32 %v2025_v28, %v906_v15 }
 0x193   :  { %v923_v39 = vsub.f32 %v2028_v51, %v904_v37 }
 0x194   :  { %v2084_v40 = vsel %vm922_vm11, %v925_v14, 0.0 }
 0x195   :  { %v957_v21 = vmul.f32 %v2084_v40, %v2084_v40  ;;  %v2090_v41 = vsel %vm922_vm11, %v923_v39, 0.0 }
 0x196   :  { %v955_v42 = vmul.f32 %v2090_v41, %v2090_v41 }
 0x197   :  { %975 = vadd.xlane.f32.xlu0 %v957_v21 }
 0x198   :  { %v881_v43 = vpop.xlane.xlu1 %880  ;;  %971 = vadd.xlane.f32.xlu1 %v955_v42  ;;  %v879_v28 = vpop.xlane.xlu2 %878 }
 0x199   :  { %v908_v31 = vmul.f32 0.03125, %v881_v43  ;;  %v907_v51 = vmul.f32 0.03125, %v879_v28 }
 0x19b   :  { %v927_v25 = vsub.f32 %v2031_v23, %v908_v31  ;;  %v926_v44 = vsub.f32 %v2033_v36, %v907_v51 }
 0x19d   :  { %v2098_v45 = vsel %vm922_vm11, %v927_v25, 0.0  ;;  %v2102_v48 = vsel %vm922_vm11, %v926_v44, 0.0 }
 0x19e   :  { %v959_v49 = vmul.f32 %v2098_v45, %v2098_v45  ;;  %v958_v52 = vmul.f32 %v2102_v48, %v2102_v48 }
 0x1a0   :  { %v887_v53 = vpop.xlane.xlu1 %886  ;;  %979 = vadd.xlane.f32.xlu2 %v959_v49  ;;  %977 = vadd.xlane.f32.xlu1 %v958_v52  ;;  %v883_v23 = vpop.xlane.xlu2 %882 }
 0x1a1   :  { %v911_v54 = vmul.f32 0.03125, %v887_v53  ;;  %v909_v36 = vmul.f32 0.03125, %v883_v23  ;;  %v885_v61 = vpop.xlane.xlu0 %884 }
 0x1a2   :  { %v910_v57 = vmul.f32 0.03125, %v885_v61 }
 0x1a3   :  { %v930_v58 = vsub.f32 %v2037_v47, %v911_v54  ;;  %v928_v1 = vsub.f32 %v2039_v29, %v909_v36 }
 0x1a4   :  { %v929_v2 = vsub.f32 %v2041_v16, %v910_v57 }
 0x1a5   :  { %v2113_v3 = vsel %vm922_vm11, %v930_v58, 0.0  ;;  %v2117_v4 = vsel %vm922_vm11, %v928_v1, 0.0 }
 0x1a6   :  { %v962_v6 = vmul.f32 %v2113_v3, %v2113_v3  ;;  %v960_v46 = vmul.f32 %v2117_v4, %v2117_v4  ;;  %v2125_v47 = vsel %vm922_vm11, %v929_v2, 0.0 }
 0x1a7   :  { %v961_v16 = vmul.f32 %v2125_v47, %v2125_v47 }
 0x1a8   :  { %v893_v29 = vpop.xlane.xlu1 %892  ;;  %985 = vadd.xlane.f32.xlu2 %v962_v6  ;;  %981 = vadd.xlane.f32.xlu0 %v960_v46 }
 0x1a9   :  { %v914_v7 = vmul.f32 0.03125, %v893_v29  ;;  %v891_v8 = vpop.xlane.xlu0 %890  ;;  %983 = vadd.xlane.f32.xlu1 %v961_v16 }
 0x1aa   :  { %v913_v11 = vmul.f32 0.03125, %v891_v8 }
 0x1ab   :  { %v933_v12 = vsub.f32 %v2048_v56, %v914_v7  ;;  %v889_v24 = vpop.xlane.xlu2 %888 }
 0x1ac   :  { %v932_v13 = vsub.f32 %v2046_v55, %v913_v11  ;;  %v912_v59 = vmul.f32 0.03125, %v889_v24 }
 0x1ad   :  { %v2133_v38 = vsel %vm922_vm11, %v933_v12, 0.0 }
 0x1ae   :  { %v965_v17 = vmul.f32 %v2133_v38, %v2133_v38  ;;  %v931_v19 = vsub.f32 %v2052_v35, %v912_v59  ;;  %v2140_v60 = vsel %vm922_vm11, %v932_v13, 0.0 }
 0x1af   :  { %v964_v56 = vmul.f32 %v2140_v60, %v2140_v60 }
 0x1b0   :  { %v899_v10 = vpop.xlane.xlu1 %898  ;;  %991 = vadd.xlane.f32.xlu2 %v965_v17  ;;  %v2146_v22 = vsel %vm922_vm11, %v931_v19, 0.0 }
 0x1b1   :  { %v917_v55 = vmul.f32 0.03125, %v899_v10  ;;  %v897_v26 = vpop.xlane.xlu0 %896  ;;  %989 = vadd.xlane.f32.xlu1 %v964_v56  ;;  %v963_v63 = vmul.f32 %v2146_v22, %v2146_v22 }
 0x1b2   :  { %v916_v35 = vmul.f32 0.03125, %v897_v26 }
 0x1b3   :  { %v936_v0 = vsub.f32 %v2057_v5, %v917_v55  ;;  %987 = vadd.xlane.f32.xlu0 %v963_v63 }
 0x1b4   :  { %v935_v30 = vsub.f32 %v2055_v9, %v916_v35 }
 0x1b5   :  { %v2154_v50 = vsel %vm922_vm11, %v936_v0, 0.0 }
 0x1b6   :  { %v968_v33 = vmul.f32 %v2154_v50, %v2154_v50  ;;  %v2160_v15 = vsel %vm922_vm11, %v935_v30, 0.0 }
 0x1b7   :  { %v967_v14 = vmul.f32 %v2160_v15, %v2160_v15 }
 0x1b8   :  { %v895_v34 = vpop.xlane.xlu2 %894  ;;  %997 = vadd.xlane.f32.xlu2 %v968_v33 }
 0x1b9   :  { %v915_v5 = vmul.f32 0.03125, %v895_v34  ;;  %995 = vadd.xlane.f32.xlu1 %v967_v14 }
 0x1ba   :  { %v903_v37 = vpop.xlane.xlu0 %902 }
 0x1bb   :  { %v934_v9 = vsub.f32 %v2061_v18, %v915_v5  ;;  %v919_v39 = vmul.f32 0.03125, %v903_v37 }
 0x1bd   :  { %v938_v21 = vsub.f32 %v2064_v20, %v919_v39  ;;  %v2168_v42 = vsel %vm922_vm11, %v934_v9, 0.0 }
 0x1be   :  { %v966_v43 = vmul.f32 %v2168_v42, %v2168_v42 }
 0x1bf   :  { %v2174_v28 = vsel %vm922_vm11, %v938_v21, 0.0 }
 0x1c0   :  { %993 = vadd.xlane.f32.xlu0 %v966_v43  ;;  %v970_v31 = vmul.f32 %v2174_v28, %v2174_v28 }
 0x1c2   :  { %1001 = vadd.xlane.f32.xlu1 %v970_v31  ;;  %v901_v18 = vpop.xlane.xlu2 %900 }
 0x1c3   :  { %v918_v51 = vmul.f32 0.03125, %v901_v18 }
 0x1c5   :  { %v937_v20 = vsub.f32 %v2067_v62, %v918_v51 }
 0x1c7   :  { %v2181_v25 = vsel %vm922_vm11, %v937_v20, 0.0 }
 0x1c8   :  { %v969_v44 = vmul.f32 %v2181_v25, %v2181_v25 }
 0x1ca   :  { %999 = vadd.xlane.f32.xlu0 %v969_v44 }
 0x1fa   :  { %v974_v49 = vpop.xlane.xlu2 %973 }
 0x1fb   :  { %v1004_v52 = vmul.f32 0.03125, %v974_v49 }
 0x1fd   :  { %v1020_v53 = vadd.f32 1e-05, %v1004_v52 }
 0x1ff   :  { %1412 = vrsqrt.f32 %v1020_v53  ;;  %vm1051_vm12 = vweird.f32 %v1020_v53 }
 0x205   :  { %v1413_v23 = vpop.eup %1412 }
 0x206   :  { %v1046_v54 = vmul.f32 %v1413_v23, %v1020_v53  ;;  %vm1052_vm8 = vweird.f32 %v1413_v23 }
 0x207   :  { %vm1053_vm5 = vmor %vm1051_vm12, %vm1052_vm8 }
 0x208   :  { %v1047_v36 = vmul.f32 %v1413_v23, %v1046_v54 }
 0x20a   :  { %v1048_v61 = vmul.f32 0.5, %v1047_v36  ;;  %v976_v57 = vpop.xlane.xlu0 %975 }
 0x20b   :  { %v1005_v58 = vmul.f32 0.03125, %v976_v57  ;;  %v972_v62 = vpop.xlane.xlu1 %971 }
 0x20c   :  { %v1049_v1 = vsub.f32 1.5, %v1048_v61  ;;  %v1003_v2 = vmul.f32 0.03125, %v972_v62 }
 0x20d   :  { %v1021_v27 = vadd.f32 1e-05, %v1005_v58 }
 0x20e   :  { %v1050_v6 = vmul.f32 %v1413_v23, %v1049_v1  ;;  %v1019_v46 = vadd.f32 1e-05, %v1003_v2 }
 0x20f   :  { %1414 = vrsqrt.f32 %v1021_v27  ;;  %vm1061_vm1 = vweird.f32 %v1021_v27 }
 0x210   :  { %v1054_v29 = vsel %vm1053_vm5, %v1413_v23, %v1050_v6  ;;  %1416 = vrsqrt.f32 %v1019_v46  ;;  %vm1041_vm6 = vweird.f32 %v1019_v46 }
 0x211   :  { %v1196_v16 = vmul.f32 %v1054_v29, %v2076_v32 }
 0x213   :  { %v1212_v7 = vmax.f32 %v1196_v16, 0.0  ;;  %v978_v8 = vpop.xlane.xlu1 %977  ;;  %v980_v11 = vpop.xlane.xlu2 %979 }
 0x214   :  { %v1006_v24 = vmul.f32 0.03125, %v978_v8  ;;  %v1007_v13 = vmul.f32 0.03125, %v980_v11 }
 0x215   :  { %v1415_v12 = vpop.eup %1414  ;;  %1228 = vst [vmem:[#allocation9 + $0x8] sm:$0xff] %v1212_v7 }
 0x216   :  { %v1056_v59 = vmul.f32 %v1415_v12, %v1021_v27  ;;  %v1417_v17 = vpop.eup %1416  ;;  %v1022_v19 = vadd.f32 1e-05, %v1006_v24  ;;  %v2186_v10 = vadd.f32 1e-05, %v1007_v13  ;;  %vm1062_vm7 = vweird.f32 %v1415_v12 }
 0x217   :  { %v1036_v55 = vmul.f32 %v1417_v17, %v1019_v46  ;;  %vm1042_vm0 = vweird.f32 %v1417_v17  ;;  %vm1063_vm4 = vmor %vm1061_vm1, %vm1062_vm7 }
 0x218   :  { %v1057_v56 = vmul.f32 %v1415_v12, %v1056_v59  ;;  %1418 = vrsqrt.f32 %v1022_v19  ;;  %vm1043_vm2 = vmor %vm1041_vm6, %vm1042_vm0  ;;  %vm1071_vm10 = vweird.f32 %v1022_v19  ;;  %vm1081_vm13 = vweird.f32 %v2186_v10 }
 0x219   :  { %v1037_v63 = vmul.f32 %v1417_v17, %v1036_v55  ;;  %1420 = vrsqrt.f32 %v2186_v10 }
 0x21a   :  { %v1058_v26 = vmul.f32 0.5, %v1057_v56 }
 0x21b   :  { %v1038_v35 = vmul.f32 0.5, %v1037_v63  ;;  %v982_v0 = vpop.xlane.xlu0 %981  ;;  %v986_v30 = vpop.xlane.xlu2 %985 }
 0x21c   :  { %v1059_v32 = vsub.f32 1.5, %v1058_v26  ;;  %v1008_v33 = vmul.f32 0.03125, %v982_v0  ;;  %v1010_v34 = vmul.f32 0.03125, %v986_v30  ;;  %v984_v37 = vpop.xlane.xlu1 %983 }
 0x21d   :  { %v1039_v5 = vsub.f32 1.5, %v1038_v35  ;;  %v1009_v39 = vmul.f32 0.03125, %v984_v37 }
 0x21e   :  { %v1060_v14 = vmul.f32 %v1415_v12, %v1059_v32  ;;  %v1419_v9 = vpop.eup %1418  ;;  %v2189_v21 = vadd.f32 1e-05, %v1008_v33  ;;  %v2191_v20 = vadd.f32 1e-05, %v1010_v34 }
 0x21f   :  { %v1421_v43 = vpop.eup %1420  ;;  %v1040_v18 = vmul.f32 %v1417_v17, %v1039_v5  ;;  %v1066_v51 = vmul.f32 %v1419_v9, %v1022_v19  ;;  %v2195_v52 = vadd.f32 1e-05, %v1009_v39  ;;  %vm1072_vm9 = vweird.f32 %v1419_v9 }
 0x220   :  { %v1064_v31 = vsel %vm1063_vm4, %v1415_v12, %v1060_v14  ;;  %v1076_v49 = vmul.f32 %v1421_v43, %v2186_v10  ;;  %1422 = vrsqrt.f32 %v2189_v21  ;;  %vm1082_vm3 = vweird.f32 %v1421_v43  ;;  %vm1073_vm14 = vmor %vm1071_vm10, %vm1072_vm9 }
 0x221   :  { %v1197_v44 = vmul.f32 %v1064_v31, %v2084_v40  ;;  %v1044_v53 = vsel %vm1043_vm2, %v1417_v17, %v1040_v18  ;;  %v1067_v23 = vmul.f32 %v1419_v9, %v1066_v51  ;;  %1424 = vrsqrt.f32 %v2195_v52  ;;  %vm1083_vm15 = vmor %vm1081_vm13, %vm1082_vm3 }
 0x222   :  { %v1195_v36 = vmul.f32 %v1044_v53, %v2090_v41  ;;  %v1077_v61 = vmul.f32 %v1421_v43, %v1076_v49  ;;  %1426 = vrsqrt.f32 %v2191_v20  ;;  %vm1091_vm11 = vweird.f32 %v2189_v21 }
 0x223   :  { %v1213_v54 = vmax.f32 %v1197_v44, 0.0  ;;  %v1068_v57 = vmul.f32 0.5, %v1067_v23  ;;  %v992_v58 = vpop.xlane.xlu2 %991  ;;  %vm1101_vm7 = vweird.f32 %v2195_v52  ;;  %vm1111_vm4 = vweird.f32 %v2191_v20 }
 0x224   :  { %v1211_v40 = vmax.f32 %v1195_v36, 0.0  ;;  %v1078_v1 = vmul.f32 0.5, %v1077_v61  ;;  %v990_v27 = vpop.xlane.xlu1 %989  ;;  %v1013_v2 = vmul.f32 0.03125, %v992_v58 }
 0x225   :  { %1229 = vst [vmem:[#allocation9 + $0x10] sm:$0xff] %v1213_v54  ;;  %v1069_v62 = vsub.f32 1.5, %v1068_v57  ;;  %v1012_v46 = vmul.f32 0.03125, %v990_v27 }
 0x226   :  { %1227 = vst [vmem:[#allocation9] sm:$0xff] %v1211_v40  ;;  %v1079_v6 = vsub.f32 1.5, %v1078_v1  ;;  %v1423_v29 = vpop.eup %1422  ;;  %v988_v16 = vpop.xlane.xlu0 %987  ;;  %v2206_v56 = vadd.f32 1e-05, %v1013_v2 }
 0x227   :  { %v1070_v41 = vmul.f32 %v1419_v9, %v1069_v62  ;;  %v1425_v7 = vpop.eup %1424  ;;  %v1086_v11 = vmul.f32 %v1423_v29, %v2189_v21  ;;  %v2203_v12 = vadd.f32 1e-05, %v1012_v46  ;;  %v1011_v17 = vmul.f32 0.03125, %v988_v16 }
 0x228   :  { %v1080_v8 = vmul.f32 %v1421_v43, %v1079_v6  ;;  %v1427_v24 = vpop.eup %1426  ;;  %v1096_v59 = vmul.f32 %v1425_v7, %v2195_v52  ;;  %vm1092_vm8 = vweird.f32 %v1423_v29  ;;  %vm1102_vm12 = vweird.f32 %v1425_v7 }
 0x229   :  { %v1074_v13 = vsel %vm1073_vm14, %v1419_v9, %v1070_v41  ;;  %v1087_v26 = vmul.f32 %v1423_v29, %v1086_v11  ;;  %v1106_v63 = vmul.f32 %v1427_v24, %v2191_v20  ;;  %1428 = vrsqrt.f32 %v2203_v12  ;;  %vm1093_vm1 = vmor %vm1091_vm11, %vm1092_vm8 }
 0x22a   :  { %v1198_v19 = vmul.f32 %v1074_v13, %v2102_v48  ;;  %v1084_v55 = vsel %vm1083_vm15, %v1421_v43, %v1080_v8  ;;  %v1097_v32 = vmul.f32 %v1425_v7, %v1096_v59  ;;  %v2213_v5 = vadd.f32 1e-05, %v1011_v17  ;;  %vm1103_vm0 = vmor %vm1101_vm7, %vm1102_vm12 }
 0x22b   :  { %v1199_v10 = vmul.f32 %v1084_v55, %v2098_v45  ;;  %v1088_v0 = vmul.f32 0.5, %v1087_v26  ;;  %v1107_v30 = vmul.f32 %v1427_v24, %v1106_v63  ;;  %v998_v33 = vpop.xlane.xlu2 %997  ;;  %1430 = vrsqrt.f32 %v2206_v56 }
 0x22c   :  { %v1214_v35 = vmax.f32 %v1198_v19, 0.0  ;;  %v1098_v14 = vmul.f32 0.5, %v1097_v32  ;;  %v996_v48 = vpop.xlane.xlu1 %995  ;;  %1432 = vrsqrt.f32 %v2213_v5  ;;  %v1016_v43 = vmul.f32 0.03125, %v998_v33 }
 0x22d   :  { %v1215_v34 = vmax.f32 %v1199_v10, 0.0  ;;  %v1089_v37 = vsub.f32 1.5, %v1088_v0  ;;  %v1108_v45 = vmul.f32 0.5, %v1107_v30  ;;  %v1015_v9 = vmul.f32 0.03125, %v996_v48 }
 0x22e   :  { %1230 = vst [vmem:[#allocation9 + $0x18] sm:$0xff] %v1214_v35  ;;  %v1099_v39 = vsub.f32 1.5, %v1098_v14  ;;  %vm1112_vm5 = vweird.f32 %v1427_v24  ;;  %v2229_v58 = vadd.f32 1e-05, %v1016_v43  ;;  %vm1131_vm9 = vweird.f32 %v2203_v12 }
 0x22f   :  { %1231 = vst [vmem:[#allocation9 + $0x20] sm:$0xff] %v1215_v34  ;;  %v1090_v31 = vmul.f32 %v1423_v29, %v1089_v37  ;;  %v1109_v18 = vsub.f32 1.5, %v1108_v45  ;;  %v2217_v51 = vadd.f32 1e-05, %v1015_v9  ;;  %v1429_v44 = vpop.eup %1428  ;;  %vm1113_vm6 = vmor %vm1111_vm4, %vm1112_vm5  ;;  %vm1141_vm13 = vweird.f32 %v2206_v56 }
 0x230   :  { %v1100_v49 = vmul.f32 %v1425_v7, %v1099_v39  ;;  %v1126_v54 = vmul.f32 %v1429_v44, %v2203_v12  ;;  %vm1132_vm2 = vweird.f32 %v1429_v44  ;;  %vm1121_vm15 = vweird.f32 %v2213_v5 }
 0x231   :  { %v1094_v53 = vsel %vm1093_vm1, %v1423_v29, %v1090_v31  ;;  %v1110_v23 = vmul.f32 %v1427_v24, %v1109_v18  ;;  %v2225_v36 = vpop.eup %1430  ;;  %1434 = vrsqrt.f32 %v2217_v51  ;;  %vm1133_vm3 = vmor %vm1131_vm9, %vm1132_vm2  ;;  %vm1161_vm5 = vweird.f32 %v2217_v51 }
 0x232   :  { %v1104_v61 = vsel %vm1103_vm0, %v1425_v7, %v1100_v49  ;;  %v1200_v57 = vmul.f32 %v1094_v53, %v2117_v4  ;;  %v1127_v1 = vmul.f32 %v1429_v44, %v1126_v54  ;;  %v1136_v20 = vmul.f32 %v2225_v36, %v2206_v56  ;;  %v1433_v62 = vpop.eup %1432 }
 0x233   :  { %v994_v52 = vpop.xlane.xlu0 %993  ;;  %v1201_v21 = vmul.f32 %v1104_v61, %v2125_v47  ;;  %v1114_v40 = vsel %vm1113_vm6, %v1427_v24, %v1110_v23  ;;  %v1116_v41 = vmul.f32 %v1433_v62, %v2213_v5  ;;  %1436 = vrsqrt.f32 %v2229_v58 }
 0x234   :  { %v1216_v27 = vmax.f32 %v1200_v57, 0.0  ;;  %v1202_v2 = vmul.f32 %v1114_v40, %v2113_v3  ;;  %v1014_v6 = vmul.f32 0.03125, %v994_v52  ;;  %v1128_v29 = vmul.f32 0.5, %v1127_v1 }
 0x235   :  { %v1002_v46 = vpop.xlane.xlu1 %1001  ;;  %v1217_v4 = vmax.f32 %v1201_v21, 0.0  ;;  %v1137_v7 = vmul.f32 %v2225_v36, %v1136_v20  ;;  %v1117_v11 = vmul.f32 %v1433_v62, %v1116_v41  ;;  %vm1142_vm10 = vweird.f32 %v2225_v36 }
 0x236   :  { %1232 = vst [vmem:[#allocation9 + $0x28] sm:$0xff] %v1216_v27  ;;  %v1218_v16 = vmax.f32 %v1202_v2, 0.0  ;;  %v2237_v47 = vadd.f32 1e-05, %v1014_v6  ;;  %v1129_v8 = vsub.f32 1.5, %v1128_v29  ;;  %v1018_v24 = vmul.f32 0.03125, %v1002_v46  ;;  %vm1143_vm11 = vmor %vm1141_vm13, %vm1142_vm10 }
 0x237   :  { %1233 = vst [vmem:[#allocation9 + $0x30] sm:$0xff] %v1217_v4  ;;  %v1435_v3 = vpop.eup %1434  ;;  %v1138_v13 = vmul.f32 0.5, %v1137_v7  ;;  %v1118_v17 = vmul.f32 0.5, %v1117_v11  ;;  %vm1122_vm14 = vweird.f32 %v1433_v62  ;;  %vm1171_vm4 = vweird.f32 %v2229_v58 }
 0x238   :  { %1234 = vst [vmem:[#allocation9 + $0x38] sm:$0xff] %v1218_v16  ;;  %1438 = vrsqrt.f32 %v2237_v47  ;;  %v1130_v59 = vmul.f32 %v1429_v44, %v1129_v8  ;;  %v1156_v19 = vmul.f32 %v1435_v3, %v2217_v51  ;;  %v2244_v26 = vadd.f32 1e-05, %v1018_v24  ;;  %vm1123_vm8 = vmor %vm1121_vm15, %vm1122_vm14 }
 0x239   :  { %v1139_v55 = vsub.f32 1.5, %v1138_v13  ;;  %v1119_v10 = vsub.f32 1.5, %v1118_v17  ;;  %v1437_v35 = vpop.eup %1436  ;;  %vm1162_vm12 = vweird.f32 %v1435_v3  ;;  %vm1151_vm6 = vweird.f32 %v2237_v47 }
 0x23a   :  { %v1134_v63 = vsel %vm1133_vm3, %v1429_v44, %v1130_v59  ;;  %v1157_v32 = vmul.f32 %v1435_v3, %v1156_v19  ;;  %1440 = vrsqrt.f32 %v2244_v26  ;;  %v1166_v34 = vmul.f32 %v1437_v35, %v2229_v58  ;;  %vm1163_vm7 = vmor %vm1161_vm5, %vm1162_vm12 }
 0x23b   :  { %v1204_v0 = vmul.f32 %v1134_v63, %v2140_v60  ;;  %v1140_v30 = vmul.f32 %v2225_v36, %v1139_v55  ;;  %v1120_v12 = vmul.f32 %v1433_v62, %v1119_v10  ;;  %vm1172_vm1 = vweird.f32 %v1437_v35 }
 0x23c   :  { %v1158_v33 = vmul.f32 0.5, %v1157_v32  ;;  %v1167_v31 = vmul.f32 %v1437_v35, %v1166_v34  ;;  %vm1173_vm2 = vmor %vm1171_vm4, %vm1172_vm1  ;;  %vm1191_vm10 = vweird.f32 %v2244_v26 }
 0x23d   :  { %v1000_v14 = vpop.xlane.xlu0 %999  ;;  %v1220_v37 = vmax.f32 %v1204_v0, 0.0  ;;  %v1144_v60 = vsel %vm1143_vm11, %v2225_v36, %v1140_v30  ;;  %v1124_v9 = vsel %vm1123_vm8, %v1433_v62, %v1120_v12 }
 0x23e   :  { %v1439_v48 = vpop.eup %1438  ;;  %v1017_v45 = vmul.f32 0.03125, %v1000_v14  ;;  %v1205_v56 = vmul.f32 %v1144_v60, %v2133_v38  ;;  %v1159_v39 = vsub.f32 1.5, %v1158_v33  ;;  %v1203_v5 = vmul.f32 %v1124_v9, %v2146_v22 }
 0x23f   :  { %v1146_v43 = vmul.f32 %v1439_v48, %v2237_v47  ;;  %1236 = vst [vmem:[#allocation9 + $0x48] sm:$0xff] %v1220_v37  ;;  %v1168_v36 = vmul.f32 0.5, %v1167_v31  ;;  %vm1152_vm0 = vweird.f32 %v1439_v48 }
 0x240   :  { %v1033_v18 = vadd.f32 1e-05, %v1017_v45  ;;  %v1221_v44 = vmax.f32 %v1205_v56, 0.0  ;;  %v1160_v49 = vmul.f32 %v1435_v3, %v1159_v39  ;;  %v1441_v23 = vpop.eup %1440  ;;  %v1219_v54 = vmax.f32 %v1203_v5, 0.0  ;;  %vm1153_vm9 = vmor %vm1151_vm6, %vm1152_vm0 }
 0x241   :  { %v1147_v53 = vmul.f32 %v1439_v48, %v1146_v43  ;;  %v1186_v57 = vmul.f32 %v1441_v23, %v2244_v26  ;;  %v1169_v52 = vsub.f32 1.5, %v1168_v36  ;;  %vm1192_vm3 = vweird.f32 %v1441_v23 }
 0x242   :  { %1442 = vrsqrt.f32 %v1033_v18  ;;  %1237 = vst [vmem:[#allocation9 + $0x50] sm:$0xff] %v1221_v44  ;;  %v1164_v38 = vsel %vm1163_vm7, %v1435_v3, %v1160_v49  ;;  %vm1193_vm14 = vmor %vm1191_vm10, %vm1192_vm3  ;;  %vm1181_vm15 = vweird.f32 %v1033_v18 }
 0x243   :  { %v1148_v61 = vmul.f32 0.5, %v1147_v53  ;;  %1235 = vst [vmem:[#allocation9 + $0x40] sm:$0xff] %v1219_v54  ;;  %v1207_v22 = vmul.f32 %v1164_v38, %v2160_v15  ;;  %v1187_v51 = vmul.f32 %v1441_v23, %v1186_v57  ;;  %v1170_v1 = vmul.f32 %v1437_v35, %v1169_v52 }
 0x245   :  { %v1149_v21 = vsub.f32 1.5, %v1148_v61  ;;  %v1223_v40 = vmax.f32 %v1207_v22, 0.0  ;;  %v1188_v62 = vmul.f32 0.5, %v1187_v51  ;;  %v1174_v2 = vsel %vm1173_vm2, %v1437_v35, %v1170_v1 }
 0x246   :  { %v1208_v6 = vmul.f32 %v1174_v2, %v2154_v50 }
 0x247   :  { %v1150_v20 = vmul.f32 %v1439_v48, %v1149_v21  ;;  %1239 = vst [vmem:[#allocation9 + $0x60] sm:$0xff] %v1223_v40  ;;  %v1189_v46 = vsub.f32 1.5, %v1188_v62 }
 0x248   :  { %v1443_v27 = vpop.eup %1442  ;;  %v1224_v41 = vmax.f32 %v1208_v6, 0.0 }
 0x249   :  { %v1154_v15 = vsel %vm1153_vm9, %v1439_v48, %v1150_v20  ;;  %v1176_v4 = vmul.f32 %v1443_v27, %v1033_v18  ;;  %v1190_v16 = vmul.f32 %v1441_v23, %v1189_v46  ;;  %vm1182_vm13 = vweird.f32 %v1443_v27 }
 0x24a   :  { %v1206_v29 = vmul.f32 %v1154_v15, %v2168_v42  ;;  %1240 = vst [vmem:[#allocation9 + $0x68] sm:$0xff] %v1224_v41  ;;  %vm1183_vm11 = vmor %vm1181_vm15, %vm1182_vm13 }
 0x24b   :  { %v1177_v58 = vmul.f32 %v1443_v27, %v1176_v4  ;;  %v1194_v47 = vsel %vm1193_vm14, %v1441_v23, %v1190_v16 }
 0x24c   :  { %v1222_v7 = vmax.f32 %v1206_v29, 0.0  ;;  %v1210_v11 = vmul.f32 %v1194_v47, %v2174_v28 }
 0x24d   :  { %v1178_v8 = vmul.f32 0.5, %v1177_v58 }
 0x24e   :  { %1238 = vst [vmem:[#allocation9 + $0x58] sm:$0xff] %v1222_v7  ;;  %v1226_v50 = vmax.f32 %v1210_v11, 0.0 }
 0x24f   :  { %v1179_v24 = vsub.f32 1.5, %v1178_v8 }
 0x250   :  { %1242 = vst [vmem:[#allocation9 + $0x78] sm:$0xff] %v1226_v50 }
 0x251   :  { %v1180_v3 = vmul.f32 %v1443_v27, %v1179_v24 }
 0x253   :  { %v1184_v42 = vsel %vm1183_vm11, %v1443_v27, %v1180_v3 }
 0x254   :  { %v1209_v13 = vmul.f32 %v1184_v42, %v2181_v25 }
 0x256   :  { %v1225_v59 = vmax.f32 %v1209_v13, 0.0 }
 0x258   :  { %1241 = vst [vmem:[#allocation9 + $0x70] sm:$0xff] %v1225_v59 }
 0x259   :  { %1255 = dma.vmem_to_hbm [thread:$0]  %s1248_s2, 2048, %s1250_s5, [#allocation5], %s1551_s28, %s1551_s28, %s1552_s29  }
 0x25a   :  { %1544 = dma.done.wait [#allocation5], 2048  }
 0x25b   :  { %1545 = vsyncadd [#allocation5], 4294965248 }
 0x25c   :  { %1260 = vsyncpa [#allocation4], 1 }
 0x25d   :  { %1261 = vsyncpa [#allocation7], 1 }
 0x25e   :  { %1262 = vsyncpa [#allocation5], 1 }

</bundles_post_ra>
